<compile_context>
chip_gen: v5e
topology: v5e:2x2
jax: 0.10.0
libtpu: 0.0.40
codegen_flags: <defaults>
</compile_context>

<pallas_src>
import jax
import jax.numpy as jnp
from jax.experimental import pallas as pl
from jax.experimental.pallas import tpu as pltpu

# ---------------- config (small synthetic shapes) ----------------
M, NC, NT = 2, 8, 8          # batch, context points, target points
DX, DY, DZ = 1, 2, 32        # input dim, output dim, latent dim
G = 16                       # number of grid pseudo-tokens
NUM_FOURIER = 4              # Fourier basis frequencies
NUM_HEADS, HEAD_DIM = 4, 8   # DZ == NUM_HEADS * HEAD_DIM
BIAS_HID = 16                # hidden width of the relative-position bias MLP
SETCONV_LENGTHSCALE = 0.5
EPS = 1e-8
assert DZ == NUM_HEADS * HEAD_DIM


# ---------------- packed-weight layout (one VMEM slab, 8-row aligned) ----------------
_PACK_ENTRIES = [
    # fused y_encoder + basis projection for context tokens, and the
    # constant target-token embedding row (flag channel folded in).
    ("w_ctx",     DY + 2 * NUM_FOURIER * DX, DZ),
    ("b_ctx",     1, DZ),
    ("zt_row",    1, DZ),
    ("grid_points", G, DX),
    # precomputed (constant) self-attention TE bias, flattened [H*G, G]
    ("bias_sa",   NUM_HEADS * G, G),
    # grid self-attention transformer layer
    ("sa_ln1_g",  1, DZ), ("sa_ln1_b", 1, DZ),
    ("sa_wqkv",   DZ, 3 * DZ), ("sa_bqkv", 1, 3 * DZ),
    ("sa_wo",     DZ, DZ), ("sa_bo", 1, DZ),
    ("sa_ln2_g",  1, DZ), ("sa_ln2_b", 1, DZ),
    ("sa_mlp_w1", DZ, 2 * DZ), ("sa_mlp_b1", 1, 2 * DZ),
    ("sa_mlp_w2", 2 * DZ, DZ), ("sa_mlp_b2", 1, DZ),
    # target -> grid cross-attention transformer layer
    ("ca_lnq_g",  1, DZ), ("ca_lnq_b", 1, DZ),
    ("ca_lnk_g",  1, DZ), ("ca_lnk_b", 1, DZ),
    ("ca_wq",     DZ, DZ), ("ca_bq", 1, DZ),
    ("ca_wkv",    DZ, 2 * DZ), ("ca_bkv", 1, 2 * DZ),
    ("ca_wo",     DZ, DZ), ("ca_bo", 1, DZ),
    ("ca_ln2_g",  1, DZ), ("ca_ln2_b", 1, DZ),
    ("ca_mlp_w1", DZ, 2 * DZ), ("ca_mlp_b1", 1, 2 * DZ),
    ("ca_mlp_w2", 2 * DZ, DZ), ("ca_mlp_b2", 1, DZ),
]

_PACK_LANES = 128


def _build_layout(entries):
    layout, off = {}, 0
    for name, rows, cols in entries:
        layout[name] = (off, rows, cols)
        off += -(-rows // 8) * 8            # 8-row (sublane) aligned starts
    return layout, -(-off // 8) * 8


_PACK_LAYOUT, _PACK_ROWS = _build_layout(_PACK_ENTRIES)


# ---------------- fused Pallas kernel (one batch element per grid step) ----------------
def _encoder_kernel(feats_ref, xct_ref, bca_ref, wp_ref, o_ref):
    f32 = jnp.float32
    nt = o_ref.shape[1]
    dz = o_ref.shape[2]

    def W(name):
        off, rows, cols = _PACK_LAYOUT[name]
        return wp_ref[off:off + rows, 0:cols]       # static slice of the weight slab

    feats = feats_ref[0]                            # [nc, dy + 2F*dx]  (= [yc | fourier(xc)])
    xct = xct_ref[0]                                # [dx, nc]
    nc = feats.shape[0]
    dx = xct.shape[0]

    # ---- fused y_encoder + add_basis (context) and constant flag-row embedding (targets).
    # TODO(synk): stochastic dropout_all(p_basis_dropout) omitted (deterministic eval path).
    zc = jnp.dot(feats, W("w_ctx"), preferred_element_type=f32) + W("b_ctx")   # [nc, dz]
    zt = jnp.zeros((nt, dz), f32) + W("zt_row")                                # [nt, dz]

    # ---- SetConv grid encoder: RBF-weighted normalized reduction onto the fixed grid.
    xg = W("grid_points")                           # [g, dx]
    g = xg.shape[0]
    d2 = jnp.zeros((g, nc), f32)
    for d in range(dx):                             # static tiny loop over dx
        diff = xg[:, d:d + 1] - xct[d:d + 1, :]     # [g, nc]
        d2 = d2 + diff * diff
    rbf = jnp.exp(d2 * (-0.5 / (SETCONV_LENGTHSCALE ** 2)))
    density = jnp.sum(rbf, axis=-1, keepdims=True)  # [g, 1]
    zc_grid = jnp.dot(rbf, zc, preferred_element_type=f32) * pl.reciprocal(
        density + EPS, approx=True)                 # [g, dz]

    # ---- in-kernel helpers (trace-time Python; everything stays in vregs/VMEM) ----
    def layer_norm(x, name):
        mu = jnp.mean(x, axis=-1, keepdims=True)
        xm = x - mu
        var = jnp.mean(xm * xm, axis=-1, keepdims=True)
        return xm * jax.lax.rsqrt(var + 1e-5) * W(f"{name}_g") + W(f"{name}_b")

    lane = jax.lax.broadcasted_iota(jnp.int32, (1, dz), 1)
    head_masks = [((lane >= h * HEAD_DIM) & (lane < (h + 1) * HEAD_DIM)).astype(f32)
                  for h in range(NUM_HEADS)]

    def attend(q, k, v, bias_all, wo_name, bo_name):
        # q already carries the 1/sqrt(dh) scale (folded into packed weights).
        nq = q.shape[0]
        out = jnp.zeros((nq, dz), f32)
        for h in range(NUM_HEADS):
            mh = head_masks[h]
            # (q*mask_h) . k^T contracts only head-h lanes; p @ (v*mask_h) writes
            # head h into its own lane slice, so summing over heads yields the
            # concatenated multi-head output directly (no reshapes/transposes).
            s = jax.lax.dot_general(q * mh, k, (((1,), (1,)), ((), ())),
                                    preferred_element_type=f32)
            s = s + bias_all[h * nq:(h + 1) * nq, :]
            s = s - jnp.max(s, axis=-1, keepdims=True)
            p = jnp.exp(s)
            p = p * pl.reciprocal(jnp.sum(p, axis=-1, keepdims=True), approx=True)
            out = out + jnp.dot(p, v * mh, preferred_element_type=f32)
        return jnp.dot(out, W(wo_name), preferred_element_type=f32) + W(bo_name)

    def mlp(x, pref):
        h1 = jnp.dot(x, W(f"{pref}_mlp_w1"), preferred_element_type=f32) + W(f"{pref}_mlp_b1")
        h1 = jax.nn.gelu(h1)
        return jnp.dot(h1, W(f"{pref}_mlp_w2"), preferred_element_type=f32) + W(f"{pref}_mlp_b2")

    # ---- grid self-attention block (pre-norm residual transformer layer)
    h_sa = layer_norm(zc_grid, "sa_ln1")
    qkv = jnp.dot(h_sa, W("sa_wqkv"), preferred_element_type=f32) + W("sa_bqkv")   # fused q|k|v
    q = qkv[:, 0:dz]
    k = qkv[:, dz:2 * dz]
    v = qkv[:, 2 * dz:3 * dz]
    zc_grid = zc_grid + attend(q, k, v, W("bias_sa"), "sa_wo", "sa_bo")
    zc_grid = zc_grid + mlp(layer_norm(zc_grid, "sa_ln2"), "sa")

    # ---- target -> grid cross-attention block
    h_q = layer_norm(zt, "ca_lnq")
    h_k = layer_norm(zc_grid, "ca_lnk")
    q = jnp.dot(h_q, W("ca_wq"), preferred_element_type=f32) + W("ca_bq")
    kv = jnp.dot(h_k, W("ca_wkv"), preferred_element_type=f32) + W("ca_bkv")       # fused k|v
    k = kv[:, 0:dz]
    v = kv[:, dz:2 * dz]
    zt = zt + attend(q, k, v, bca_ref[0], "ca_wo", "ca_bo")
    zt = zt + mlp(layer_norm(zt, "ca_ln2"), "ca")

    o_ref[0] = zt.astype(o_ref.dtype)


# ---------------- wrapper-side helpers ----------------
def _te_bias(xq, xk, w1, b1, w2, b2):
    """Translation-equivariant rel-pos bias MLP: returns [..., nq, nk, H]."""
    rel = xq[..., :, None, :] - xk[..., None, :, :]
    hid = jax.nn.relu(rel @ w1 + b1)
    return hid @ w2 + b2


def _pack_weights(params):
    """Pack (and pre-fuse) every weight into one [R, 128] f32 VMEM slab."""
    p = params
    f32 = jnp.float32
    scale = 1.0 / (HEAD_DIM ** 0.5)

    def r1(x):
        return jnp.asarray(x, f32).reshape(1, -1)

    vals = {}
    vals["w_ctx"] = jnp.concatenate([p["y_enc_w"][:DY], p["basis_w"]], axis=0)
    vals["b_ctx"] = r1(p["y_enc_b"] + p["basis_b"])
    vals["zt_row"] = r1(p["y_enc_w"][DY] + p["y_enc_b"])
    vals["grid_points"] = p["grid_points"]

    # constant self-attention TE bias (grid <-> grid), [H*G, G]
    bsa = _te_bias(p["grid_points"], p["grid_points"],
                   p["sa_bw1"], p["sa_bb1"], p["sa_bw2"], p["sa_bb2"])   # [G, G, H]
    vals["bias_sa"] = jnp.transpose(bsa, (2, 0, 1)).reshape(NUM_HEADS * G, G)

    for name in ("sa_ln1", "sa_ln2", "ca_lnq", "ca_lnk", "ca_ln2"):
        vals[f"{name}_g"] = r1(p[f"{name}_g"])
        vals[f"{name}_b"] = r1(p[f"{name}_b"])

    # fused q|k|v (self-attn) with 1/sqrt(dh) folded into q
    vals["sa_wqkv"] = jnp.concatenate([p["sa_wq"] * scale, p["sa_wk"], p["sa_wv"]], axis=1)
    vals["sa_bqkv"] = r1(jnp.concatenate([p["sa_bq"] * scale, p["sa_bk"], p["sa_bv"]]))
    vals["sa_wo"], vals["sa_bo"] = p["sa_wo"], r1(p["sa_bo"])
    # cross-attn: q separate (different source), fused k|v
    vals["ca_wq"], vals["ca_bq"] = p["ca_wq"] * scale, r1(p["ca_bq"] * scale)
    vals["ca_wkv"] = jnp.concatenate([p["ca_wk"], p["ca_wv"]], axis=1)
    vals["ca_bkv"] = r1(jnp.concatenate([p["ca_bk"], p["ca_bv"]]))
    vals["ca_wo"], vals["ca_bo"] = p["ca_wo"], r1(p["ca_bo"])

    for pref in ("sa", "ca"):
        vals[f"{pref}_mlp_w1"] = p[f"{pref}_mlp_w1"]
        vals[f"{pref}_mlp_b1"] = r1(p[f"{pref}_mlp_b1"])
        vals[f"{pref}_mlp_w2"] = p[f"{pref}_mlp_w2"]
        vals[f"{pref}_mlp_b2"] = r1(p[f"{pref}_mlp_b2"])

    wpack = jnp.zeros((_PACK_ROWS, _PACK_LANES), f32)
    for name, rows, cols in _PACK_ENTRIES:
        off = _PACK_LAYOUT[name][0]
        wpack = wpack.at[off:off + rows, :cols].set(
            jnp.asarray(vals[name], f32).reshape(rows, cols))
    return wpack


# ---------------- wrapper: one pallas_call for the whole forward ----------------
def gridded_atetnp_encoder(xc, yc, xt, params):
    m, nc, dx = xc.shape
    nt = xt.shape[1]

    # Fourier basis features folded into the single context-feature input.
    freqs = params["fourier_freqs"]                                  # [F]
    ang = 2.0 * jnp.pi * xc[..., None] * freqs                       # [m, nc, dx, F]
    phi = jnp.concatenate([jnp.sin(ang), jnp.cos(ang)], axis=-1).reshape(
        m, nc, 2 * NUM_FOURIER * dx)
    feats = jnp.concatenate([yc.astype(jnp.float32), phi], axis=-1)  # [m, nc, dy+2F*dx]
    xct = jnp.transpose(xc, (0, 2, 1))                               # [m, dx, nc]

    # Cross-attention TE bias (depends on xt) computed vectorized in the wrapper.
    bca = _te_bias(xt, params["grid_points"],
                   params["ca_bw1"], params["ca_bb1"],
                   params["ca_bw2"], params["ca_bb2"])               # [m, nt, G, H]
    bca = jnp.transpose(bca, (0, 3, 1, 2)).reshape(m, NUM_HEADS * nt, G)

    wpack = _pack_weights(params)                                    # [R, 128] single slab
    dfeat = feats.shape[-1]

    return pl.pallas_call(
        _encoder_kernel,
        out_shape=jax.ShapeDtypeStruct((m, nt, DZ), jnp.float32),
        grid=(m,),
        in_specs=[
            pl.BlockSpec((1, nc, dfeat), lambda b: (b, 0, 0)),
            pl.BlockSpec((1, dx, nc), lambda b: (b, 0, 0)),
            pl.BlockSpec((1, NUM_HEADS * nt, G), lambda b: (b, 0, 0)),
            pl.BlockSpec((_PACK_ROWS, _PACK_LANES), lambda b: (0, 0)),
        ],
        out_specs=pl.BlockSpec((1, nt, DZ), lambda b: (b, 0, 0)),
        compiler_params=pltpu.CompilerParams(dimension_semantics=("parallel",)),
    )(feats, xct, bca, wpack)


# ---------------- deterministic parameter init ----------------
def init_params(key):
    p = {}

    def dense(k, din, dout):
        w = jax.random.normal(k, (din, dout), jnp.float32) / jnp.sqrt(din)
        return w, jnp.zeros((dout,), jnp.float32)

    keys = iter(jax.random.split(key, 64))
    p["y_enc_w"], p["y_enc_b"] = dense(next(keys), DY + 1, DZ)
    p["basis_w"], p["basis_b"] = dense(next(keys), 2 * NUM_FOURIER * DX, DZ)
    p["fourier_freqs"] = jnp.arange(1, NUM_FOURIER + 1, dtype=jnp.float32)
    p["grid_points"] = jnp.linspace(-2.0, 2.0, G, dtype=jnp.float32).reshape(G, DX)
    for pref in ("sa", "ca"):
        p[f"{pref}_wq"], p[f"{pref}_bq"] = dense(next(keys), DZ, NUM_HEADS * HEAD_DIM)
        p[f"{pref}_wk"], p[f"{pref}_bk"] = dense(next(keys), DZ, NUM_HEADS * HEAD_DIM)
        p[f"{pref}_wv"], p[f"{pref}_bv"] = dense(next(keys), DZ, NUM_HEADS * HEAD_DIM)
        p[f"{pref}_wo"], p[f"{pref}_bo"] = dense(next(keys), NUM_HEADS * HEAD_DIM, DZ)
        p[f"{pref}_bw1"], p[f"{pref}_bb1"] = dense(next(keys), DX, BIAS_HID)
        p[f"{pref}_bw2"], p[f"{pref}_bb2"] = dense(next(keys), BIAS_HID, NUM_HEADS)
        p[f"{pref}_mlp_w1"], p[f"{pref}_mlp_b1"] = dense(next(keys), DZ, 2 * DZ)
        p[f"{pref}_mlp_w2"], p[f"{pref}_mlp_b2"] = dense(next(keys), 2 * DZ, DZ)
    for name in ("sa_ln1", "sa_ln2", "ca_lnq", "ca_lnk", "ca_ln2"):
        p[f"{name}_g"] = jnp.ones((DZ,), jnp.float32)
        p[f"{name}_b"] = jnp.zeros((DZ,), jnp.float32)
    return p


if __name__ == "__main__":
    key = jax.random.PRNGKey(0)
    k_p, k_xc, k_yc, k_xt = jax.random.split(key, 4)
    params = init_params(k_p)
    xc = jax.random.uniform(k_xc, (M, NC, DX), jnp.float32, minval=-2.0, maxval=2.0)
    yc = jax.random.normal(k_yc, (M, NC, DY), jnp.float32)
    xt = jax.random.uniform(k_xt, (M, NT, DX), jnp.float32, minval=-2.0, maxval=2.0)

    fwd = jax.jit(gridded_atetnp_encoder)
    zt = fwd(xc, yc, xt, params)
    jax.block_until_ready(zt)
    assert zt.shape == (M, NT, DZ) and zt.dtype == jnp.float32
    assert bool(jnp.all(jnp.isfinite(zt)))
    print("KERNEL_OK")
</pallas_src>

<mosaic_0001>
module attributes {stable_mosaic.version = 11 : i64} {
  func.func @_encoder_kernel(%arg0: i32, %arg1: memref<1x8x10xf32, #tpu.memory_space<vmem>>, %arg2: memref<1x1x8xf32, #tpu.memory_space<vmem>>, %arg3: memref<1x32x16xf32, #tpu.memory_space<vmem>>, %arg4: memref<616x128xf32, #tpu.memory_space<vmem>>, %arg5: memref<1x8x32xf32, #tpu.memory_space<vmem>>) attributes {dimension_semantics = [#tpu.dimension_semantics<parallel>], iteration_bounds = array<i64: 2>, scalar_prefetch = 0 : i64, scratch_operands = 0 : i64, tpu.core_type = #tpu.core_type<tc>, window_params = [{transform_indices = @transform_0, window_bounds = array<i64: 1, 8, 10>}, {transform_indices = @transform_1, window_bounds = array<i64: 1, 1, 8>}, {transform_indices = @transform_2, window_bounds = array<i64: 1, 32, 16>}, {pipeline_mode = #tpu.pipeline_mode<synchronous>, transform_indices = @transform_3, window_bounds = array<i64: 616, 128>}, {transform_indices = @transform_4, window_bounds = array<i64: 1, 8, 32>}]} {
    %c0 = arith.constant 0 : index
    %c0_0 = arith.constant 0 : index
    %c0_1 = arith.constant 0 : index
    %0 = vector.load %arg1[%c0, %c0_0, %c0_1] : memref<1x8x10xf32, #tpu.memory_space<vmem>>, vector<1x8x10xf32>
    %1 = vector.shape_cast %0 : vector<1x8x10xf32> to vector<8x10xf32>
    %c0_2 = arith.constant 0 : index
    %c0_3 = arith.constant 0 : index
    %c0_4 = arith.constant 0 : index
    %2 = vector.load %arg2[%c0_2, %c0_3, %c0_4] : memref<1x1x8xf32, #tpu.memory_space<vmem>>, vector<1x1x8xf32>
    %3 = vector.shape_cast %2 : vector<1x1x8xf32> to vector<1x8xf32>
    %c0_5 = arith.constant 0 : index
    %c0_6 = arith.constant 0 : index
    %4 = vector.load %arg4[%c0_5, %c0_6] : memref<616x128xf32, #tpu.memory_space<vmem>>, vector<10x32xf32>
    %cst = arith.constant dense<0.000000e+00> : vector<8x32xf32>
    %5 = tpu.matmul %1, %4, %cst {dimension_numbers = #tpu.dot_dimension_numbers<[1], [0], [0], [1], [0, 0, 1, 1], [], []>} : vector<8x10xf32>, vector<10x32xf32>, vector<8x32xf32> -> vector<8x32xf32>
    %c16 = arith.constant 16 : index
    %c0_7 = arith.constant 0 : index
    %6 = vector.load %arg4[%c16, %c0_7] : memref<616x128xf32, #tpu.memory_space<vmem>>, vector<1x32xf32>
    %7 = vector.broadcast %6 : vector<1x32xf32> to vector<8x32xf32>
    %8 = arith.addf %5, %7 : vector<8x32xf32>
    %cst_8 = arith.constant 0.000000e+00 : f32
    %9 = vector.broadcast %cst_8 : f32 to vector<8x32xf32>
    %c24 = arith.constant 24 : index
    %c0_9 = arith.constant 0 : index
    %10 = vector.load %arg4[%c24, %c0_9] : memref<616x128xf32, #tpu.memory_space<vmem>>, vector<1x32xf32>
    %11 = vector.broadcast %10 : vector<1x32xf32> to vector<8x32xf32>
    %12 = arith.addf %9, %11 : vector<8x32xf32>
    %c32 = arith.constant 32 : index
    %c0_10 = arith.constant 0 : index
    %13 = vector.load %arg4[%c32, %c0_10] : memref<616x128xf32, #tpu.memory_space<vmem>>, vector<16x1xf32>
    %cst_11 = arith.constant 0.000000e+00 : f32
    %14 = vector.broadcast %cst_11 : f32 to vector<16x8xf32>
    %15 = vector.broadcast %13 : vector<16x1xf32> to vector<16x8xf32>
    %16 = vector.broadcast %3 : vector<1x8xf32> to vector<16x8xf32>
    %17 = arith.subf %15, %16 : vector<16x8xf32>
    %18 = arith.mulf %17, %17 : vector<16x8xf32>
    %19 = arith.addf %14, %18 : vector<16x8xf32>
    %cst_12 = arith.constant -2.000000e+00 : f32
    %20 = vector.broadcast %cst_12 : f32 to vector<16x8xf32>
    %21 = arith.mulf %19, %20 : vector<16x8xf32>
    %22 = math.exp %21 : vector<16x8xf32>
    %cst_13 = arith.constant dense<0.000000e+00> : vector<16xf32>
    %23 = vector.multi_reduction <add>, %22, %cst_13 [1] : vector<16x8xf32> to vector<16xf32>
    %24 = vector.shape_cast %23 : vector<16xf32> to vector<16x1xf32>
    %cst_14 = arith.constant dense<0.000000e+00> : vector<16x32xf32>
    %25 = tpu.matmul %22, %8, %cst_14 {dimension_numbers = #tpu.dot_dimension_numbers<[1], [0], [0], [1], [0, 0, 1, 1], [], []>} : vector<16x8xf32>, vector<8x32xf32>, vector<16x32xf32> -> vector<16x32xf32>
    %cst_15 = arith.constant 9.99999993E-9 : f32
    %26 = vector.broadcast %cst_15 : f32 to vector<16x1xf32>
    %27 = arith.addf %24, %26 : vector<16x1xf32>
    %28 = tpu.reciprocal %27 {approx = true} : vector<16x1xf32> -> vector<16x1xf32>
    %29 = vector.broadcast %28 : vector<16x1xf32> to vector<16x32xf32>
    %30 = arith.mulf %25, %29 : vector<16x32xf32>
    %31 = tpu.iota {dimensions = array<i32: 1>} : vector<1x32xi32>
    %c0_i32 = arith.constant 0 : i32
    %32 = vector.broadcast %c0_i32 : i32 to vector<1x32xi32>
    %33 = arith.cmpi sge, %31, %32 : vector<1x32xi32>
    %c8_i32 = arith.constant 8 : i32
    %34 = vector.broadcast %c8_i32 : i32 to vector<1x32xi32>
    %35 = arith.cmpi slt, %31, %34 : vector<1x32xi32>
    %36 = arith.andi %33, %35 : vector<1x32xi1>
    %37 = arith.extui %36 : vector<1x32xi1> to vector<1x32xi32>
    %38 = arith.sitofp %37 : vector<1x32xi32> to vector<1x32xf32>
    %c8_i32_16 = arith.constant 8 : i32
    %39 = vector.broadcast %c8_i32_16 : i32 to vector<1x32xi32>
    %40 = arith.cmpi sge, %31, %39 : vector<1x32xi32>
    %c16_i32 = arith.constant 16 : i32
    %41 = vector.broadcast %c16_i32 : i32 to vector<1x32xi32>
    %42 = arith.cmpi slt, %31, %41 : vector<1x32xi32>
    %43 = arith.andi %40, %42 : vector<1x32xi1>
    %44 = arith.extui %43 : vector<1x32xi1> to vector<1x32xi32>
    %45 = arith.sitofp %44 : vector<1x32xi32> to vector<1x32xf32>
    %c16_i32_17 = arith.constant 16 : i32
    %46 = vector.broadcast %c16_i32_17 : i32 to vector<1x32xi32>
    %47 = arith.cmpi sge, %31, %46 : vector<1x32xi32>
    %c24_i32 = arith.constant 24 : i32
    %48 = vector.broadcast %c24_i32 : i32 to vector<1x32xi32>
    %49 = arith.cmpi slt, %31, %48 : vector<1x32xi32>
    %50 = arith.andi %47, %49 : vector<1x32xi1>
    %51 = arith.extui %50 : vector<1x32xi1> to vector<1x32xi32>
    %52 = arith.sitofp %51 : vector<1x32xi32> to vector<1x32xf32>
    %c24_i32_18 = arith.constant 24 : i32
    %53 = vector.broadcast %c24_i32_18 : i32 to vector<1x32xi32>
    %54 = arith.cmpi sge, %31, %53 : vector<1x32xi32>
    %c32_i32 = arith.constant 32 : i32
    %55 = vector.broadcast %c32_i32 : i32 to vector<1x32xi32>
    %56 = arith.cmpi slt, %31, %55 : vector<1x32xi32>
    %57 = arith.andi %54, %56 : vector<1x32xi1>
    %58 = arith.extui %57 : vector<1x32xi1> to vector<1x32xi32>
    %59 = arith.sitofp %58 : vector<1x32xi32> to vector<1x32xf32>
    %cst_19 = arith.constant dense<0.000000e+00> : vector<16xf32>
    %60 = vector.multi_reduction <add>, %30, %cst_19 [1] : vector<16x32xf32> to vector<16xf32>
    %61 = vector.shape_cast %60 : vector<16xf32> to vector<16x1xf32>
    %cst_20 = arith.constant 3.200000e+01 : f32
    %62 = vector.broadcast %cst_20 : f32 to vector<16x1xf32>
    %63 = arith.divf %61, %62 : vector<16x1xf32>
    %64 = vector.broadcast %63 : vector<16x1xf32> to vector<16x32xf32>
    %65 = arith.subf %30, %64 : vector<16x32xf32>
    %66 = arith.mulf %65, %65 : vector<16x32xf32>
    %cst_21 = arith.constant dense<0.000000e+00> : vector<16xf32>
    %67 = vector.multi_reduction <add>, %66, %cst_21 [1] : vector<16x32xf32> to vector<16xf32>
    %68 = vector.shape_cast %67 : vector<16xf32> to vector<16x1xf32>
    %cst_22 = arith.constant 3.200000e+01 : f32
    %69 = vector.broadcast %cst_22 : f32 to vector<16x1xf32>
    %70 = arith.divf %68, %69 : vector<16x1xf32>
    %cst_23 = arith.constant 9.99999974E-6 : f32
    %71 = vector.broadcast %cst_23 : f32 to vector<16x1xf32>
    %72 = arith.addf %70, %71 : vector<16x1xf32>
    %73 = math.rsqrt %72 : vector<16x1xf32>
    %74 = vector.broadcast %73 : vector<16x1xf32> to vector<16x32xf32>
    %75 = arith.mulf %65, %74 : vector<16x32xf32>
    %c112 = arith.constant 112 : index
    %c0_24 = arith.constant 0 : index
    %76 = vector.load %arg4[%c112, %c0_24] : memref<616x128xf32, #tpu.memory_space<vmem>>, vector<1x32xf32>
    %77 = vector.broadcast %76 : vector<1x32xf32> to vector<16x32xf32>
    %78 = arith.mulf %75, %77 : vector<16x32xf32>
    %c120 = arith.constant 120 : index
    %c0_25 = arith.constant 0 : index
    %79 = vector.load %arg4[%c120, %c0_25] : memref<616x128xf32, #tpu.memory_space<vmem>>, vector<1x32xf32>
    %80 = vector.broadcast %79 : vector<1x32xf32> to vector<16x32xf32>
    %81 = arith.addf %78, %80 : vector<16x32xf32>
    %c128 = arith.constant 128 : index
    %c0_26 = arith.constant 0 : index
    %82 = vector.load %arg4[%c128, %c0_26] : memref<616x128xf32, #tpu.memory_space<vmem>>, vector<32x96xf32>
    %cst_27 = arith.constant dense<0.000000e+00> : vector<16x96xf32>
    %83 = tpu.matmul %81, %82, %cst_27 {dimension_numbers = #tpu.dot_dimension_numbers<[1], [0], [0], [1], [0, 0, 1, 1], [], []>} : vector<16x32xf32>, vector<32x96xf32>, vector<16x96xf32> -> vector<16x96xf32>
    %c160 = arith.constant 160 : index
    %c0_28 = arith.constant 0 : index
    %84 = vector.load %arg4[%c160, %c0_28] : memref<616x128xf32, #tpu.memory_space<vmem>>, vector<1x96xf32>
    %85 = vector.broadcast %84 : vector<1x96xf32> to vector<16x96xf32>
    %86 = arith.addf %83, %85 : vector<16x96xf32>
    %87 = vector.extract_strided_slice %86 {offsets = [0, 0], sizes = [16, 32], strides = [1, 1]} : vector<16x96xf32> to vector<16x32xf32>
    %88 = vector.extract_strided_slice %86 {offsets = [0, 32], sizes = [16, 32], strides = [1, 1]} : vector<16x96xf32> to vector<16x32xf32>
    %89 = vector.extract_strided_slice %86 {offsets = [0, 64], sizes = [16, 32], strides = [1, 1]} : vector<16x96xf32> to vector<16x32xf32>
    %c48 = arith.constant 48 : index
    %c0_29 = arith.constant 0 : index
    %90 = vector.load %arg4[%c48, %c0_29] : memref<616x128xf32, #tpu.memory_space<vmem>>, vector<64x16xf32>
    %cst_30 = arith.constant 0.000000e+00 : f32
    %91 = vector.broadcast %cst_30 : f32 to vector<16x32xf32>
    %92 = vector.broadcast %38 : vector<1x32xf32> to vector<16x32xf32>
    %93 = arith.mulf %87, %92 : vector<16x32xf32>
    %cst_31 = arith.constant dense<0.000000e+00> : vector<16x16xf32>
    %94 = tpu.matmul %93, %88, %cst_31 {dimension_numbers = #tpu.dot_dimension_numbers<[1], [1], [0], [0], [0, 0, 1, 0], [], []>} : vector<16x32xf32>, vector<16x32xf32>, vector<16x16xf32> -> vector<16x16xf32>
    %95 = vector.extract_strided_slice %90 {offsets = [0, 0], sizes = [16, 16], strides = [1, 1]} : vector<64x16xf32> to vector<16x16xf32>
    %96 = arith.addf %94, %95 : vector<16x16xf32>
    %cst_32 = arith.constant dense<0xFF800000> : vector<16xf32>
    %97 = vector.multi_reduction <maximumf>, %96, %cst_32 [1] : vector<16x16xf32> to vector<16xf32>
    %98 = vector.shape_cast %97 : vector<16xf32> to vector<16x1xf32>
    %99 = vector.broadcast %98 : vector<16x1xf32> to vector<16x16xf32>
    %100 = arith.subf %96, %99 : vector<16x16xf32>
    %101 = math.exp %100 : vector<16x16xf32>
    %cst_33 = arith.constant dense<0.000000e+00> : vector<16xf32>
    %102 = vector.multi_reduction <add>, %101, %cst_33 [1] : vector<16x16xf32> to vector<16xf32>
    %103 = vector.shape_cast %102 : vector<16xf32> to vector<16x1xf32>
    %104 = tpu.reciprocal %103 {approx = true} : vector<16x1xf32> -> vector<16x1xf32>
    %105 = vector.broadcast %104 : vector<16x1xf32> to vector<16x16xf32>
    %106 = arith.mulf %101, %105 : vector<16x16xf32>
    %107 = vector.broadcast %38 : vector<1x32xf32> to vector<16x32xf32>
    %108 = arith.mulf %89, %107 : vector<16x32xf32>
    %cst_34 = arith.constant dense<0.000000e+00> : vector<16x32xf32>
    %109 = tpu.matmul %106, %108, %cst_34 {dimension_numbers = #tpu.dot_dimension_numbers<[1], [0], [0], [1], [0, 0, 1, 1], [], []>} : vector<16x16xf32>, vector<16x32xf32>, vector<16x32xf32> -> vector<16x32xf32>
    %110 = arith.addf %91, %109 : vector<16x32xf32>
    %111 = vector.broadcast %45 : vector<1x32xf32> to vector<16x32xf32>
    %112 = arith.mulf %87, %111 : vector<16x32xf32>
    %cst_35 = arith.constant dense<0.000000e+00> : vector<16x16xf32>
    %113 = tpu.matmul %112, %88, %cst_35 {dimension_numbers = #tpu.dot_dimension_numbers<[1], [1], [0], [0], [0, 0, 1, 0], [], []>} : vector<16x32xf32>, vector<16x32xf32>, vector<16x16xf32> -> vector<16x16xf32>
    %114 = vector.extract_strided_slice %90 {offsets = [16, 0], sizes = [16, 16], strides = [1, 1]} : vector<64x16xf32> to vector<16x16xf32>
    %115 = arith.addf %113, %114 : vector<16x16xf32>
    %cst_36 = arith.constant dense<0xFF800000> : vector<16xf32>
    %116 = vector.multi_reduction <maximumf>, %115, %cst_36 [1] : vector<16x16xf32> to vector<16xf32>
    %117 = vector.shape_cast %116 : vector<16xf32> to vector<16x1xf32>
    %118 = vector.broadcast %117 : vector<16x1xf32> to vector<16x16xf32>
    %119 = arith.subf %115, %118 : vector<16x16xf32>
    %120 = math.exp %119 : vector<16x16xf32>
    %cst_37 = arith.constant dense<0.000000e+00> : vector<16xf32>
    %121 = vector.multi_reduction <add>, %120, %cst_37 [1] : vector<16x16xf32> to vector<16xf32>
    %122 = vector.shape_cast %121 : vector<16xf32> to vector<16x1xf32>
    %123 = tpu.reciprocal %122 {approx = true} : vector<16x1xf32> -> vector<16x1xf32>
    %124 = vector.broadcast %123 : vector<16x1xf32> to vector<16x16xf32>
    %125 = arith.mulf %120, %124 : vector<16x16xf32>
    %126 = vector.broadcast %45 : vector<1x32xf32> to vector<16x32xf32>
    %127 = arith.mulf %89, %126 : vector<16x32xf32>
    %cst_38 = arith.constant dense<0.000000e+00> : vector<16x32xf32>
    %128 = tpu.matmul %125, %127, %cst_38 {dimension_numbers = #tpu.dot_dimension_numbers<[1], [0], [0], [1], [0, 0, 1, 1], [], []>} : vector<16x16xf32>, vector<16x32xf32>, vector<16x32xf32> -> vector<16x32xf32>
    %129 = arith.addf %110, %128 : vector<16x32xf32>
    %130 = vector.broadcast %52 : vector<1x32xf32> to vector<16x32xf32>
    %131 = arith.mulf %87, %130 : vector<16x32xf32>
    %cst_39 = arith.constant dense<0.000000e+00> : vector<16x16xf32>
    %132 = tpu.matmul %131, %88, %cst_39 {dimension_numbers = #tpu.dot_dimension_numbers<[1], [1], [0], [0], [0, 0, 1, 0], [], []>} : vector<16x32xf32>, vector<16x32xf32>, vector<16x16xf32> -> vector<16x16xf32>
    %133 = vector.extract_strided_slice %90 {offsets = [32, 0], sizes = [16, 16], strides = [1, 1]} : vector<64x16xf32> to vector<16x16xf32>
    %134 = arith.addf %132, %133 : vector<16x16xf32>
    %cst_40 = arith.constant dense<0xFF800000> : vector<16xf32>
    %135 = vector.multi_reduction <maximumf>, %134, %cst_40 [1] : vector<16x16xf32> to vector<16xf32>
    %136 = vector.shape_cast %135 : vector<16xf32> to vector<16x1xf32>
    %137 = vector.broadcast %136 : vector<16x1xf32> to vector<16x16xf32>
    %138 = arith.subf %134, %137 : vector<16x16xf32>
    %139 = math.exp %138 : vector<16x16xf32>
    %cst_41 = arith.constant dense<0.000000e+00> : vector<16xf32>
    %140 = vector.multi_reduction <add>, %139, %cst_41 [1] : vector<16x16xf32> to vector<16xf32>
    %141 = vector.shape_cast %140 : vector<16xf32> to vector<16x1xf32>
    %142 = tpu.reciprocal %141 {approx = true} : vector<16x1xf32> -> vector<16x1xf32>
    %143 = vector.broadcast %142 : vector<16x1xf32> to vector<16x16xf32>
    %144 = arith.mulf %139, %143 : vector<16x16xf32>
    %145 = vector.broadcast %52 : vector<1x32xf32> to vector<16x32xf32>
    %146 = arith.mulf %89, %145 : vector<16x32xf32>
    %cst_42 = arith.constant dense<0.000000e+00> : vector<16x32xf32>
    %147 = tpu.matmul %144, %146, %cst_42 {dimension_numbers = #tpu.dot_dimension_numbers<[1], [0], [0], [1], [0, 0, 1, 1], [], []>} : vector<16x16xf32>, vector<16x32xf32>, vector<16x32xf32> -> vector<16x32xf32>
    %148 = arith.addf %129, %147 : vector<16x32xf32>
    %149 = vector.broadcast %59 : vector<1x32xf32> to vector<16x32xf32>
    %150 = arith.mulf %87, %149 : vector<16x32xf32>
    %cst_43 = arith.constant dense<0.000000e+00> : vector<16x16xf32>
    %151 = tpu.matmul %150, %88, %cst_43 {dimension_numbers = #tpu.dot_dimension_numbers<[1], [1], [0], [0], [0, 0, 1, 0], [], []>} : vector<16x32xf32>, vector<16x32xf32>, vector<16x16xf32> -> vector<16x16xf32>
    %152 = vector.extract_strided_slice %90 {offsets = [48, 0], sizes = [16, 16], strides = [1, 1]} : vector<64x16xf32> to vector<16x16xf32>
    %153 = arith.addf %151, %152 : vector<16x16xf32>
    %cst_44 = arith.constant dense<0xFF800000> : vector<16xf32>
    %154 = vector.multi_reduction <maximumf>, %153, %cst_44 [1] : vector<16x16xf32> to vector<16xf32>
    %155 = vector.shape_cast %154 : vector<16xf32> to vector<16x1xf32>
    %156 = vector.broadcast %155 : vector<16x1xf32> to vector<16x16xf32>
    %157 = arith.subf %153, %156 : vector<16x16xf32>
    %158 = math.exp %157 : vector<16x16xf32>
    %cst_45 = arith.constant dense<0.000000e+00> : vector<16xf32>
    %159 = vector.multi_reduction <add>, %158, %cst_45 [1] : vector<16x16xf32> to vector<16xf32>
    %160 = vector.shape_cast %159 : vector<16xf32> to vector<16x1xf32>
    %161 = tpu.reciprocal %160 {approx = true} : vector<16x1xf32> -> vector<16x1xf32>
    %162 = vector.broadcast %161 : vector<16x1xf32> to vector<16x16xf32>
    %163 = arith.mulf %158, %162 : vector<16x16xf32>
    %164 = vector.broadcast %59 : vector<1x32xf32> to vector<16x32xf32>
    %165 = arith.mulf %89, %164 : vector<16x32xf32>
    %cst_46 = arith.constant dense<0.000000e+00> : vector<16x32xf32>
    %166 = tpu.matmul %163, %165, %cst_46 {dimension_numbers = #tpu.dot_dimension_numbers<[1], [0], [0], [1], [0, 0, 1, 1], [], []>} : vector<16x16xf32>, vector<16x32xf32>, vector<16x32xf32> -> vector<16x32xf32>
    %167 = arith.addf %148, %166 : vector<16x32xf32>
    %c168 = arith.constant 168 : index
    %c0_47 = arith.constant 0 : index
    %168 = vector.load %arg4[%c168, %c0_47] : memref<616x128xf32, #tpu.memory_space<vmem>>, vector<32x32xf32>
    %cst_48 = arith.constant dense<0.000000e+00> : vector<16x32xf32>
    %169 = tpu.matmul %167, %168, %cst_48 {dimension_numbers = #tpu.dot_dimension_numbers<[1], [0], [0], [1], [0, 0, 1, 1], [], []>} : vector<16x32xf32>, vector<32x32xf32>, vector<16x32xf32> -> vector<16x32xf32>
    %c200 = arith.constant 200 : index
    %c0_49 = arith.constant 0 : index
    %170 = vector.load %arg4[%c200, %c0_49] : memref<616x128xf32, #tpu.memory_space<vmem>>, vector<1x32xf32>
    %171 = vector.broadcast %170 : vector<1x32xf32> to vector<16x32xf32>
    %172 = arith.addf %169, %171 : vector<16x32xf32>
    %173 = arith.addf %30, %172 : vector<16x32xf32>
    %cst_50 = arith.constant dense<0.000000e+00> : vector<16xf32>
    %174 = vector.multi_reduction <add>, %173, %cst_50 [1] : vector<16x32xf32> to vector<16xf32>
    %175 = vector.shape_cast %174 : vector<16xf32> to vector<16x1xf32>
    %cst_51 = arith.constant 3.200000e+01 : f32
    %176 = vector.broadcast %cst_51 : f32 to vector<16x1xf32>
    %177 = arith.divf %175, %176 : vector<16x1xf32>
    %178 = vector.broadcast %177 : vector<16x1xf32> to vector<16x32xf32>
    %179 = arith.subf %173, %178 : vector<16x32xf32>
    %180 = arith.mulf %179, %179 : vector<16x32xf32>
    %cst_52 = arith.constant dense<0.000000e+00> : vector<16xf32>
    %181 = vector.multi_reduction <add>, %180, %cst_52 [1] : vector<16x32xf32> to vector<16xf32>
    %182 = vector.shape_cast %181 : vector<16xf32> to vector<16x1xf32>
    %cst_53 = arith.constant 3.200000e+01 : f32
    %183 = vector.broadcast %cst_53 : f32 to vector<16x1xf32>
    %184 = arith.divf %182, %183 : vector<16x1xf32>
    %cst_54 = arith.constant 9.99999974E-6 : f32
    %185 = vector.broadcast %cst_54 : f32 to vector<16x1xf32>
    %186 = arith.addf %184, %185 : vector<16x1xf32>
    %187 = math.rsqrt %186 : vector<16x1xf32>
    %188 = vector.broadcast %187 : vector<16x1xf32> to vector<16x32xf32>
    %189 = arith.mulf %179, %188 : vector<16x32xf32>
    %c208 = arith.constant 208 : index
    %c0_55 = arith.constant 0 : index
    %190 = vector.load %arg4[%c208, %c0_55] : memref<616x128xf32, #tpu.memory_space<vmem>>, vector<1x32xf32>
    %191 = vector.broadcast %190 : vector<1x32xf32> to vector<16x32xf32>
    %192 = arith.mulf %189, %191 : vector<16x32xf32>
    %c216 = arith.constant 216 : index
    %c0_56 = arith.constant 0 : index
    %193 = vector.load %arg4[%c216, %c0_56] : memref<616x128xf32, #tpu.memory_space<vmem>>, vector<1x32xf32>
    %194 = vector.broadcast %193 : vector<1x32xf32> to vector<16x32xf32>
    %195 = arith.addf %192, %194 : vector<16x32xf32>
    %c224 = arith.constant 224 : index
    %c0_57 = arith.constant 0 : index
    %196 = vector.load %arg4[%c224, %c0_57] : memref<616x128xf32, #tpu.memory_space<vmem>>, vector<32x64xf32>
    %cst_58 = arith.constant dense<0.000000e+00> : vector<16x64xf32>
    %197 = tpu.matmul %195, %196, %cst_58 {dimension_numbers = #tpu.dot_dimension_numbers<[1], [0], [0], [1], [0, 0, 1, 1], [], []>} : vector<16x32xf32>, vector<32x64xf32>, vector<16x64xf32> -> vector<16x64xf32>
    %c256 = arith.constant 256 : index
    %c0_59 = arith.constant 0 : index
    %198 = vector.load %arg4[%c256, %c0_59] : memref<616x128xf32, #tpu.memory_space<vmem>>, vector<1x64xf32>
    %199 = vector.broadcast %198 : vector<1x64xf32> to vector<16x64xf32>
    %200 = arith.addf %197, %199 : vector<16x64xf32>
    %201 = arith.mulf %200, %200 : vector<16x64xf32>
    %202 = arith.mulf %200, %201 : vector<16x64xf32>
    %cst_60 = arith.constant 4.471500e-02 : f32
    %203 = vector.broadcast %cst_60 : f32 to vector<16x64xf32>
    %204 = arith.mulf %203, %202 : vector<16x64xf32>
    %205 = arith.addf %200, %204 : vector<16x64xf32>
    %cst_61 = arith.constant 0.797884583 : f32
    %206 = vector.broadcast %cst_61 : f32 to vector<16x64xf32>
    %207 = arith.mulf %206, %205 : vector<16x64xf32>
    %208 = math.tanh %207 : vector<16x64xf32>
    %cst_62 = arith.constant 1.000000e+00 : f32
    %209 = vector.broadcast %cst_62 : f32 to vector<16x64xf32>
    %210 = arith.addf %209, %208 : vector<16x64xf32>
    %cst_63 = arith.constant 5.000000e-01 : f32
    %211 = vector.broadcast %cst_63 : f32 to vector<16x64xf32>
    %212 = arith.mulf %211, %210 : vector<16x64xf32>
    %213 = arith.mulf %200, %212 : vector<16x64xf32>
    %c264 = arith.constant 264 : index
    %c0_64 = arith.constant 0 : index
    %214 = vector.load %arg4[%c264, %c0_64] : memref<616x128xf32, #tpu.memory_space<vmem>>, vector<64x32xf32>
    %cst_65 = arith.constant dense<0.000000e+00> : vector<16x32xf32>
    %215 = tpu.matmul %213, %214, %cst_65 {dimension_numbers = #tpu.dot_dimension_numbers<[1], [0], [0], [1], [0, 0, 1, 1], [], []>} : vector<16x64xf32>, vector<64x32xf32>, vector<16x32xf32> -> vector<16x32xf32>
    %c328 = arith.constant 328 : index
    %c0_66 = arith.constant 0 : index
    %216 = vector.load %arg4[%c328, %c0_66] : memref<616x128xf32, #tpu.memory_space<vmem>>, vector<1x32xf32>
    %217 = vector.broadcast %216 : vector<1x32xf32> to vector<16x32xf32>
    %218 = arith.addf %215, %217 : vector<16x32xf32>
    %219 = arith.addf %173, %218 : vector<16x32xf32>
    %cst_67 = arith.constant dense<0.000000e+00> : vector<8xf32>
    %220 = vector.multi_reduction <add>, %12, %cst_67 [1] : vector<8x32xf32> to vector<8xf32>
    %221 = vector.shape_cast %220 : vector<8xf32> to vector<8x1xf32>
    %cst_68 = arith.constant 3.200000e+01 : f32
    %222 = vector.broadcast %cst_68 : f32 to vector<8x1xf32>
    %223 = arith.divf %221, %222 : vector<8x1xf32>
    %224 = vector.broadcast %223 : vector<8x1xf32> to vector<8x32xf32>
    %225 = arith.subf %12, %224 : vector<8x32xf32>
    %226 = arith.mulf %225, %225 : vector<8x32xf32>
    %cst_69 = arith.constant dense<0.000000e+00> : vector<8xf32>
    %227 = vector.multi_reduction <add>, %226, %cst_69 [1] : vector<8x32xf32> to vector<8xf32>
    %228 = vector.shape_cast %227 : vector<8xf32> to vector<8x1xf32>
    %cst_70 = arith.constant 3.200000e+01 : f32
    %229 = vector.broadcast %cst_70 : f32 to vector<8x1xf32>
    %230 = arith.divf %228, %229 : vector<8x1xf32>
    %cst_71 = arith.constant 9.99999974E-6 : f32
    %231 = vector.broadcast %cst_71 : f32 to vector<8x1xf32>
    %232 = arith.addf %230, %231 : vector<8x1xf32>
    %233 = math.rsqrt %232 : vector<8x1xf32>
    %234 = vector.broadcast %233 : vector<8x1xf32> to vector<8x32xf32>
    %235 = arith.mulf %225, %234 : vector<8x32xf32>
    %c336 = arith.constant 336 : index
    %c0_72 = arith.constant 0 : index
    %236 = vector.load %arg4[%c336, %c0_72] : memref<616x128xf32, #tpu.memory_space<vmem>>, vector<1x32xf32>
    %237 = vector.broadcast %236 : vector<1x32xf32> to vector<8x32xf32>
    %238 = arith.mulf %235, %237 : vector<8x32xf32>
    %c344 = arith.constant 344 : index
    %c0_73 = arith.constant 0 : index
    %239 = vector.load %arg4[%c344, %c0_73] : memref<616x128xf32, #tpu.memory_space<vmem>>, vector<1x32xf32>
    %240 = vector.broadcast %239 : vector<1x32xf32> to vector<8x32xf32>
    %241 = arith.addf %238, %240 : vector<8x32xf32>
    %cst_74 = arith.constant dense<0.000000e+00> : vector<16xf32>
    %242 = vector.multi_reduction <add>, %219, %cst_74 [1] : vector<16x32xf32> to vector<16xf32>
    %243 = vector.shape_cast %242 : vector<16xf32> to vector<16x1xf32>
    %cst_75 = arith.constant 3.200000e+01 : f32
    %244 = vector.broadcast %cst_75 : f32 to vector<16x1xf32>
    %245 = arith.divf %243, %244 : vector<16x1xf32>
    %246 = vector.broadcast %245 : vector<16x1xf32> to vector<16x32xf32>
    %247 = arith.subf %219, %246 : vector<16x32xf32>
    %248 = arith.mulf %247, %247 : vector<16x32xf32>
    %cst_76 = arith.constant dense<0.000000e+00> : vector<16xf32>
    %249 = vector.multi_reduction <add>, %248, %cst_76 [1] : vector<16x32xf32> to vector<16xf32>
    %250 = vector.shape_cast %249 : vector<16xf32> to vector<16x1xf32>
    %cst_77 = arith.constant 3.200000e+01 : f32
    %251 = vector.broadcast %cst_77 : f32 to vector<16x1xf32>
    %252 = arith.divf %250, %251 : vector<16x1xf32>
    %cst_78 = arith.constant 9.99999974E-6 : f32
    %253 = vector.broadcast %cst_78 : f32 to vector<16x1xf32>
    %254 = arith.addf %252, %253 : vector<16x1xf32>
    %255 = math.rsqrt %254 : vector<16x1xf32>
    %256 = vector.broadcast %255 : vector<16x1xf32> to vector<16x32xf32>
    %257 = arith.mulf %247, %256 : vector<16x32xf32>
    %c352 = arith.constant 352 : index
    %c0_79 = arith.constant 0 : index
    %258 = vector.load %arg4[%c352, %c0_79] : memref<616x128xf32, #tpu.memory_space<vmem>>, vector<1x32xf32>
    %259 = vector.broadcast %258 : vector<1x32xf32> to vector<16x32xf32>
    %260 = arith.mulf %257, %259 : vector<16x32xf32>
    %c360 = arith.constant 360 : index
    %c0_80 = arith.constant 0 : index
    %261 = vector.load %arg4[%c360, %c0_80] : memref<616x128xf32, #tpu.memory_space<vmem>>, vector<1x32xf32>
    %262 = vector.broadcast %261 : vector<1x32xf32> to vector<16x32xf32>
    %263 = arith.addf %260, %262 : vector<16x32xf32>
    %c368 = arith.constant 368 : index
    %c0_81 = arith.constant 0 : index
    %264 = vector.load %arg4[%c368, %c0_81] : memref<616x128xf32, #tpu.memory_space<vmem>>, vector<32x32xf32>
    %cst_82 = arith.constant dense<0.000000e+00> : vector<8x32xf32>
    %265 = tpu.matmul %241, %264, %cst_82 {dimension_numbers = #tpu.dot_dimension_numbers<[1], [0], [0], [1], [0, 0, 1, 1], [], []>} : vector<8x32xf32>, vector<32x32xf32>, vector<8x32xf32> -> vector<8x32xf32>
    %c400 = arith.constant 400 : index
    %c0_83 = arith.constant 0 : index
    %266 = vector.load %arg4[%c400, %c0_83] : memref<616x128xf32, #tpu.memory_space<vmem>>, vector<1x32xf32>
    %267 = vector.broadcast %266 : vector<1x32xf32> to vector<8x32xf32>
    %268 = arith.addf %265, %267 : vector<8x32xf32>
    %c408 = arith.constant 408 : index
    %c0_84 = arith.constant 0 : index
    %269 = vector.load %arg4[%c408, %c0_84] : memref<616x128xf32, #tpu.memory_space<vmem>>, vector<32x64xf32>
    %cst_85 = arith.constant dense<0.000000e+00> : vector<16x64xf32>
    %270 = tpu.matmul %263, %269, %cst_85 {dimension_numbers = #tpu.dot_dimension_numbers<[1], [0], [0], [1], [0, 0, 1, 1], [], []>} : vector<16x32xf32>, vector<32x64xf32>, vector<16x64xf32> -> vector<16x64xf32>
    %c440 = arith.constant 440 : index
    %c0_86 = arith.constant 0 : index
    %271 = vector.load %arg4[%c440, %c0_86] : memref<616x128xf32, #tpu.memory_space<vmem>>, vector<1x64xf32>
    %272 = vector.broadcast %271 : vector<1x64xf32> to vector<16x64xf32>
    %273 = arith.addf %270, %272 : vector<16x64xf32>
    %274 = vector.extract_strided_slice %273 {offsets = [0, 0], sizes = [16, 32], strides = [1, 1]} : vector<16x64xf32> to vector<16x32xf32>
    %275 = vector.extract_strided_slice %273 {offsets = [0, 32], sizes = [16, 32], strides = [1, 1]} : vector<16x64xf32> to vector<16x32xf32>
    %c0_87 = arith.constant 0 : index
    %c0_88 = arith.constant 0 : index
    %c0_89 = arith.constant 0 : index
    %276 = vector.load %arg3[%c0_87, %c0_88, %c0_89] : memref<1x32x16xf32, #tpu.memory_space<vmem>>, vector<1x32x16xf32>
    %277 = vector.shape_cast %276 : vector<1x32x16xf32> to vector<32x16xf32>
    %cst_90 = arith.constant 0.000000e+00 : f32
    %278 = vector.broadcast %cst_90 : f32 to vector<8x32xf32>
    %279 = vector.broadcast %38 : vector<1x32xf32> to vector<8x32xf32>
    %280 = arith.mulf %268, %279 : vector<8x32xf32>
    %cst_91 = arith.constant dense<0.000000e+00> : vector<8x16xf32>
    %281 = tpu.matmul %280, %274, %cst_91 {dimension_numbers = #tpu.dot_dimension_numbers<[1], [1], [0], [0], [0, 0, 1, 0], [], []>} : vector<8x32xf32>, vector<16x32xf32>, vector<8x16xf32> -> vector<8x16xf32>
    %282 = vector.extract_strided_slice %277 {offsets = [0, 0], sizes = [8, 16], strides = [1, 1]} : vector<32x16xf32> to vector<8x16xf32>
    %283 = arith.addf %281, %282 : vector<8x16xf32>
    %cst_92 = arith.constant dense<0xFF800000> : vector<8xf32>
    %284 = vector.multi_reduction <maximumf>, %283, %cst_92 [1] : vector<8x16xf32> to vector<8xf32>
    %285 = vector.shape_cast %284 : vector<8xf32> to vector<8x1xf32>
    %286 = vector.broadcast %285 : vector<8x1xf32> to vector<8x16xf32>
    %287 = arith.subf %283, %286 : vector<8x16xf32>
    %288 = math.exp %287 : vector<8x16xf32>
    %cst_93 = arith.constant dense<0.000000e+00> : vector<8xf32>
    %289 = vector.multi_reduction <add>, %288, %cst_93 [1] : vector<8x16xf32> to vector<8xf32>
    %290 = vector.shape_cast %289 : vector<8xf32> to vector<8x1xf32>
    %291 = tpu.reciprocal %290 {approx = true} : vector<8x1xf32> -> vector<8x1xf32>
    %292 = vector.broadcast %291 : vector<8x1xf32> to vector<8x16xf32>
    %293 = arith.mulf %288, %292 : vector<8x16xf32>
    %294 = vector.broadcast %38 : vector<1x32xf32> to vector<16x32xf32>
    %295 = arith.mulf %275, %294 : vector<16x32xf32>
    %cst_94 = arith.constant dense<0.000000e+00> : vector<8x32xf32>
    %296 = tpu.matmul %293, %295, %cst_94 {dimension_numbers = #tpu.dot_dimension_numbers<[1], [0], [0], [1], [0, 0, 1, 1], [], []>} : vector<8x16xf32>, vector<16x32xf32>, vector<8x32xf32> -> vector<8x32xf32>
    %297 = arith.addf %278, %296 : vector<8x32xf32>
    %298 = vector.broadcast %45 : vector<1x32xf32> to vector<8x32xf32>
    %299 = arith.mulf %268, %298 : vector<8x32xf32>
    %cst_95 = arith.constant dense<0.000000e+00> : vector<8x16xf32>
    %300 = tpu.matmul %299, %274, %cst_95 {dimension_numbers = #tpu.dot_dimension_numbers<[1], [1], [0], [0], [0, 0, 1, 0], [], []>} : vector<8x32xf32>, vector<16x32xf32>, vector<8x16xf32> -> vector<8x16xf32>
    %301 = vector.extract_strided_slice %277 {offsets = [8, 0], sizes = [8, 16], strides = [1, 1]} : vector<32x16xf32> to vector<8x16xf32>
    %302 = arith.addf %300, %301 : vector<8x16xf32>
    %cst_96 = arith.constant dense<0xFF800000> : vector<8xf32>
    %303 = vector.multi_reduction <maximumf>, %302, %cst_96 [1] : vector<8x16xf32> to vector<8xf32>
    %304 = vector.shape_cast %303 : vector<8xf32> to vector<8x1xf32>
    %305 = vector.broadcast %304 : vector<8x1xf32> to vector<8x16xf32>
    %306 = arith.subf %302, %305 : vector<8x16xf32>
    %307 = math.exp %306 : vector<8x16xf32>
    %cst_97 = arith.constant dense<0.000000e+00> : vector<8xf32>
    %308 = vector.multi_reduction <add>, %307, %cst_97 [1] : vector<8x16xf32> to vector<8xf32>
    %309 = vector.shape_cast %308 : vector<8xf32> to vector<8x1xf32>
    %310 = tpu.reciprocal %309 {approx = true} : vector<8x1xf32> -> vector<8x1xf32>
    %311 = vector.broadcast %310 : vector<8x1xf32> to vector<8x16xf32>
    %312 = arith.mulf %307, %311 : vector<8x16xf32>
    %313 = vector.broadcast %45 : vector<1x32xf32> to vector<16x32xf32>
    %314 = arith.mulf %275, %313 : vector<16x32xf32>
    %cst_98 = arith.constant dense<0.000000e+00> : vector<8x32xf32>
    %315 = tpu.matmul %312, %314, %cst_98 {dimension_numbers = #tpu.dot_dimension_numbers<[1], [0], [0], [1], [0, 0, 1, 1], [], []>} : vector<8x16xf32>, vector<16x32xf32>, vector<8x32xf32> -> vector<8x32xf32>
    %316 = arith.addf %297, %315 : vector<8x32xf32>
    %317 = vector.broadcast %52 : vector<1x32xf32> to vector<8x32xf32>
    %318 = arith.mulf %268, %317 : vector<8x32xf32>
    %cst_99 = arith.constant dense<0.000000e+00> : vector<8x16xf32>
    %319 = tpu.matmul %318, %274, %cst_99 {dimension_numbers = #tpu.dot_dimension_numbers<[1], [1], [0], [0], [0, 0, 1, 0], [], []>} : vector<8x32xf32>, vector<16x32xf32>, vector<8x16xf32> -> vector<8x16xf32>
    %320 = vector.extract_strided_slice %277 {offsets = [16, 0], sizes = [8, 16], strides = [1, 1]} : vector<32x16xf32> to vector<8x16xf32>
    %321 = arith.addf %319, %320 : vector<8x16xf32>
    %cst_100 = arith.constant dense<0xFF800000> : vector<8xf32>
    %322 = vector.multi_reduction <maximumf>, %321, %cst_100 [1] : vector<8x16xf32> to vector<8xf32>
    %323 = vector.shape_cast %322 : vector<8xf32> to vector<8x1xf32>
    %324 = vector.broadcast %323 : vector<8x1xf32> to vector<8x16xf32>
    %325 = arith.subf %321, %324 : vector<8x16xf32>
    %326 = math.exp %325 : vector<8x16xf32>
    %cst_101 = arith.constant dense<0.000000e+00> : vector<8xf32>
    %327 = vector.multi_reduction <add>, %326, %cst_101 [1] : vector<8x16xf32> to vector<8xf32>
    %328 = vector.shape_cast %327 : vector<8xf32> to vector<8x1xf32>
    %329 = tpu.reciprocal %328 {approx = true} : vector<8x1xf32> -> vector<8x1xf32>
    %330 = vector.broadcast %329 : vector<8x1xf32> to vector<8x16xf32>
    %331 = arith.mulf %326, %330 : vector<8x16xf32>
    %332 = vector.broadcast %52 : vector<1x32xf32> to vector<16x32xf32>
    %333 = arith.mulf %275, %332 : vector<16x32xf32>
    %cst_102 = arith.constant dense<0.000000e+00> : vector<8x32xf32>
    %334 = tpu.matmul %331, %333, %cst_102 {dimension_numbers = #tpu.dot_dimension_numbers<[1], [0], [0], [1], [0, 0, 1, 1], [], []>} : vector<8x16xf32>, vector<16x32xf32>, vector<8x32xf32> -> vector<8x32xf32>
    %335 = arith.addf %316, %334 : vector<8x32xf32>
    %336 = vector.broadcast %59 : vector<1x32xf32> to vector<8x32xf32>
    %337 = arith.mulf %268, %336 : vector<8x32xf32>
    %cst_103 = arith.constant dense<0.000000e+00> : vector<8x16xf32>
    %338 = tpu.matmul %337, %274, %cst_103 {dimension_numbers = #tpu.dot_dimension_numbers<[1], [1], [0], [0], [0, 0, 1, 0], [], []>} : vector<8x32xf32>, vector<16x32xf32>, vector<8x16xf32> -> vector<8x16xf32>
    %339 = vector.extract_strided_slice %277 {offsets = [24, 0], sizes = [8, 16], strides = [1, 1]} : vector<32x16xf32> to vector<8x16xf32>
    %340 = arith.addf %338, %339 : vector<8x16xf32>
    %cst_104 = arith.constant dense<0xFF800000> : vector<8xf32>
    %341 = vector.multi_reduction <maximumf>, %340, %cst_104 [1] : vector<8x16xf32> to vector<8xf32>
    %342 = vector.shape_cast %341 : vector<8xf32> to vector<8x1xf32>
    %343 = vector.broadcast %342 : vector<8x1xf32> to vector<8x16xf32>
    %344 = arith.subf %340, %343 : vector<8x16xf32>
    %345 = math.exp %344 : vector<8x16xf32>
    %cst_105 = arith.constant dense<0.000000e+00> : vector<8xf32>
    %346 = vector.multi_reduction <add>, %345, %cst_105 [1] : vector<8x16xf32> to vector<8xf32>
    %347 = vector.shape_cast %346 : vector<8xf32> to vector<8x1xf32>
    %348 = tpu.reciprocal %347 {approx = true} : vector<8x1xf32> -> vector<8x1xf32>
    %349 = vector.broadcast %348 : vector<8x1xf32> to vector<8x16xf32>
    %350 = arith.mulf %345, %349 : vector<8x16xf32>
    %351 = vector.broadcast %59 : vector<1x32xf32> to vector<16x32xf32>
    %352 = arith.mulf %275, %351 : vector<16x32xf32>
    %cst_106 = arith.constant dense<0.000000e+00> : vector<8x32xf32>
    %353 = tpu.matmul %350, %352, %cst_106 {dimension_numbers = #tpu.dot_dimension_numbers<[1], [0], [0], [1], [0, 0, 1, 1], [], []>} : vector<8x16xf32>, vector<16x32xf32>, vector<8x32xf32> -> vector<8x32xf32>
    %354 = arith.addf %335, %353 : vector<8x32xf32>
    %c448 = arith.constant 448 : index
    %c0_107 = arith.constant 0 : index
    %355 = vector.load %arg4[%c448, %c0_107] : memref<616x128xf32, #tpu.memory_space<vmem>>, vector<32x32xf32>
    %cst_108 = arith.constant dense<0.000000e+00> : vector<8x32xf32>
    %356 = tpu.matmul %354, %355, %cst_108 {dimension_numbers = #tpu.dot_dimension_numbers<[1], [0], [0], [1], [0, 0, 1, 1], [], []>} : vector<8x32xf32>, vector<32x32xf32>, vector<8x32xf32> -> vector<8x32xf32>
    %c480 = arith.constant 480 : index
    %c0_109 = arith.constant 0 : index
    %357 = vector.load %arg4[%c480, %c0_109] : memref<616x128xf32, #tpu.memory_space<vmem>>, vector<1x32xf32>
    %358 = vector.broadcast %357 : vector<1x32xf32> to vector<8x32xf32>
    %359 = arith.addf %356, %358 : vector<8x32xf32>
    %360 = arith.addf %12, %359 : vector<8x32xf32>
    %cst_110 = arith.constant dense<0.000000e+00> : vector<8xf32>
    %361 = vector.multi_reduction <add>, %360, %cst_110 [1] : vector<8x32xf32> to vector<8xf32>
    %362 = vector.shape_cast %361 : vector<8xf32> to vector<8x1xf32>
    %cst_111 = arith.constant 3.200000e+01 : f32
    %363 = vector.broadcast %cst_111 : f32 to vector<8x1xf32>
    %364 = arith.divf %362, %363 : vector<8x1xf32>
    %365 = vector.broadcast %364 : vector<8x1xf32> to vector<8x32xf32>
    %366 = arith.subf %360, %365 : vector<8x32xf32>
    %367 = arith.mulf %366, %366 : vector<8x32xf32>
    %cst_112 = arith.constant dense<0.000000e+00> : vector<8xf32>
    %368 = vector.multi_reduction <add>, %367, %cst_112 [1] : vector<8x32xf32> to vector<8xf32>
    %369 = vector.shape_cast %368 : vector<8xf32> to vector<8x1xf32>
    %cst_113 = arith.constant 3.200000e+01 : f32
    %370 = vector.broadcast %cst_113 : f32 to vector<8x1xf32>
    %371 = arith.divf %369, %370 : vector<8x1xf32>
    %cst_114 = arith.constant 9.99999974E-6 : f32
    %372 = vector.broadcast %cst_114 : f32 to vector<8x1xf32>
    %373 = arith.addf %371, %372 : vector<8x1xf32>
    %374 = math.rsqrt %373 : vector<8x1xf32>
    %375 = vector.broadcast %374 : vector<8x1xf32> to vector<8x32xf32>
    %376 = arith.mulf %366, %375 : vector<8x32xf32>
    %c488 = arith.constant 488 : index
    %c0_115 = arith.constant 0 : index
    %377 = vector.load %arg4[%c488, %c0_115] : memref<616x128xf32, #tpu.memory_space<vmem>>, vector<1x32xf32>
    %378 = vector.broadcast %377 : vector<1x32xf32> to vector<8x32xf32>
    %379 = arith.mulf %376, %378 : vector<8x32xf32>
    %c496 = arith.constant 496 : index
    %c0_116 = arith.constant 0 : index
    %380 = vector.load %arg4[%c496, %c0_116] : memref<616x128xf32, #tpu.memory_space<vmem>>, vector<1x32xf32>
    %381 = vector.broadcast %380 : vector<1x32xf32> to vector<8x32xf32>
    %382 = arith.addf %379, %381 : vector<8x32xf32>
    %c504 = arith.constant 504 : index
    %c0_117 = arith.constant 0 : index
    %383 = vector.load %arg4[%c504, %c0_117] : memref<616x128xf32, #tpu.memory_space<vmem>>, vector<32x64xf32>
    %cst_118 = arith.constant dense<0.000000e+00> : vector<8x64xf32>
    %384 = tpu.matmul %382, %383, %cst_118 {dimension_numbers = #tpu.dot_dimension_numbers<[1], [0], [0], [1], [0, 0, 1, 1], [], []>} : vector<8x32xf32>, vector<32x64xf32>, vector<8x64xf32> -> vector<8x64xf32>
    %c536 = arith.constant 536 : index
    %c0_119 = arith.constant 0 : index
    %385 = vector.load %arg4[%c536, %c0_119] : memref<616x128xf32, #tpu.memory_space<vmem>>, vector<1x64xf32>
    %386 = vector.broadcast %385 : vector<1x64xf32> to vector<8x64xf32>
    %387 = arith.addf %384, %386 : vector<8x64xf32>
    %388 = arith.mulf %387, %387 : vector<8x64xf32>
    %389 = arith.mulf %387, %388 : vector<8x64xf32>
    %cst_120 = arith.constant 4.471500e-02 : f32
    %390 = vector.broadcast %cst_120 : f32 to vector<8x64xf32>
    %391 = arith.mulf %390, %389 : vector<8x64xf32>
    %392 = arith.addf %387, %391 : vector<8x64xf32>
    %cst_121 = arith.constant 0.797884583 : f32
    %393 = vector.broadcast %cst_121 : f32 to vector<8x64xf32>
    %394 = arith.mulf %393, %392 : vector<8x64xf32>
    %395 = math.tanh %394 : vector<8x64xf32>
    %cst_122 = arith.constant 1.000000e+00 : f32
    %396 = vector.broadcast %cst_122 : f32 to vector<8x64xf32>
    %397 = arith.addf %396, %395 : vector<8x64xf32>
    %cst_123 = arith.constant 5.000000e-01 : f32
    %398 = vector.broadcast %cst_123 : f32 to vector<8x64xf32>
    %399 = arith.mulf %398, %397 : vector<8x64xf32>
    %400 = arith.mulf %387, %399 : vector<8x64xf32>
    %c544 = arith.constant 544 : index
    %c0_124 = arith.constant 0 : index
    %401 = vector.load %arg4[%c544, %c0_124] : memref<616x128xf32, #tpu.memory_space<vmem>>, vector<64x32xf32>
    %cst_125 = arith.constant dense<0.000000e+00> : vector<8x32xf32>
    %402 = tpu.matmul %400, %401, %cst_125 {dimension_numbers = #tpu.dot_dimension_numbers<[1], [0], [0], [1], [0, 0, 1, 1], [], []>} : vector<8x64xf32>, vector<64x32xf32>, vector<8x32xf32> -> vector<8x32xf32>
    %c608 = arith.constant 608 : index
    %c0_126 = arith.constant 0 : index
    %403 = vector.load %arg4[%c608, %c0_126] : memref<616x128xf32, #tpu.memory_space<vmem>>, vector<1x32xf32>
    %404 = vector.broadcast %403 : vector<1x32xf32> to vector<8x32xf32>
    %405 = arith.addf %402, %404 : vector<8x32xf32>
    %406 = arith.addf %360, %405 : vector<8x32xf32>
    %c0_127 = arith.constant 0 : index
    %c0_128 = arith.constant 0 : index
    %c0_129 = arith.constant 0 : index
    %407 = vector.load %arg5[%c0_127, %c0_128, %c0_129] : memref<1x8x32xf32, #tpu.memory_space<vmem>>, vector<1x8x32xf32>
    %408 = vector.shape_cast %407 : vector<1x8x32xf32> to vector<8x32xf32>
    %409 = vector.shape_cast %406 : vector<8x32xf32> to vector<1x8x32xf32>
    tpu.vector_store %arg5[%c0_127, %c0_128, %c0_129], %409 {strides = array<i32>} : memref<1x8x32xf32, #tpu.memory_space<vmem>>, vector<1x8x32xf32>,
    return
  }
  func.func @transform_0(%arg0: i32) -> (i32, i32, i32) {
    %c0_i32 = arith.constant 0 : i32
    %c0_i32_0 = arith.constant 0 : i32
    %c0_i32_1 = arith.constant 0 : i32
    return %arg0, %c0_i32, %c0_i32_0 : i32, i32, i32
  }
  func.func @transform_1(%arg0: i32) -> (i32, i32, i32) {
    %c0_i32 = arith.constant 0 : i32
    %c0_i32_0 = arith.constant 0 : i32
    %c0_i32_1 = arith.constant 0 : i32
    return %arg0, %c0_i32, %c0_i32_0 : i32, i32, i32
  }
  func.func @transform_2(%arg0: i32) -> (i32, i32, i32) {
    %c0_i32 = arith.constant 0 : i32
    %c0_i32_0 = arith.constant 0 : i32
    %c0_i32_1 = arith.constant 0 : i32
    return %arg0, %c0_i32, %c0_i32_0 : i32, i32, i32
  }
  func.func @transform_3(%arg0: i32) -> (i32, i32) {
    %c0_i32 = arith.constant 0 : i32
    %c0_i32_0 = arith.constant 0 : i32
    %c0_i32_1 = arith.constant 0 : i32
    return %c0_i32, %c0_i32_0 : i32, i32
  }
  func.func @transform_4(%arg0: i32) -> (i32, i32, i32) {
    %c0_i32 = arith.constant 0 : i32
    %c0_i32_0 = arith.constant 0 : i32
    %c0_i32_1 = arith.constant 0 : i32
    return %arg0, %c0_i32, %c0_i32_0 : i32, i32, i32
  }
}

</mosaic_0001>

<bundles_post_ra>
// kernel: gridded_atetnp_encoder.1
= control target key start
LH: loop header
LB: loop body
LE: loop exit
PB: predicated region body
PF: predicated region fallthrough
CT: control target
= control target key end

     0   :  { %9 = vsyncpa [#allocation3], 0  ;;  %s2698_s0 = inlined_call_operand.vmem [shape: f32[2,8,10], index: 0, kind: input, shape index: {}]   ;;  %s2699_s1 = inlined_call_operand.vmem [shape: f32[2,1,8], index: 1, kind: input, shape index: {}]   ;;  %s2700_s2 = inlined_call_operand.vmem [shape: f32[2,32,16], index: 2, kind: input, shape index: {}]   ;;  %s2701_s3 = inlined_call_operand.vmem [shape: f32[616,128], index: 3, kind: input, shape index: {}]   ;;  %s2702_s4 = inlined_call_operand.hbm [shape: f32[2,8,32], index: 4, kind: output, shape index: {}]  }
   0x1   :  { %11 = vsyncpa [#allocation3 + $0x1], 0  ;;  %s2077_s15 = smov 0   ;;  %s2079_s16 = smov 0  }
   0x2   :  { %s2081_s17 = smov 0   ;;  %s2083_s18 = smov 0  }
   0x3 LB: > { %s2098_s19 = sadd.s32 4294967295, %s2044_s18   ;;  %s1708_s20 = sadd.s32 4294967294, %s2044_s18   ;;  %s2044_s18 = sphi %s2083_s18, %s2708_s18   ;;  %s2040_s17 = sphi %s2081_s17, %s2707_s17   ;;  %s2036_s16 = sphi %s2079_s16, %s2706_s16   ;;  %s2032_s15 = sphi %s2077_s15, %s2705_s15  }
   0x4   : > { %s2102_s21 = sadd.s32 1, %s2044_s18   ;;  %s123_s22 = sadd.s32 1, %s2040_s17 }
   0x5   : > { %s120_s23 = ssub.s32 %s2044_s18, %s2102_s21  ;;  %p133_p0 = scmp.ne.s32.totalorder %s2040_s17, %s2036_s16 }
   0x6   : > { %p121_p1 = scmp.eq.s32.totalorder %s120_s23, 0  ;;  %p134_p2 = scmp.eq.s32.totalorder %s2098_s19, 1 }
   0x7   : > { %p139_p3 = scmp.ne.s32.totalorder %s2036_s16, %s2032_s15  ;;  %p140_p4 = scmp.eq.s32.totalorder %s1708_s20, 1 }
   0x8   : > { %s2113_s24 = scalar_select %p121_p1, %s2040_s17, %s123_s22  }
   0x9   : > { %p2115_p5 = por %p134_p2, %p133_p0  ;;  %p2119_p6 = por %p140_p4, %p139_p3 }
   0xa   : > { %p1711_p7 = scmp.ge.s32.totalorder %s2044_s18, 1  ;;  %p182_p8 = scmp.lt.s32.totalorder %s2044_s18, 3 }
   0xc   : > { %p183_p9 = pnand %p1711_p7, %p182_p8 }
   0xd   : > { %p215_p10 = scmp.lt.s32.totalorder (!%p183_p9), %s2098_s19, 1  ;;  %s2049_s11 = smov (!%p183_p9), 64  }
   0xe   : > { %186 = sbr.rel (%p183_p9) target bundleno = 4452 (0x1164), region = 36  ;;  %s2050_s27 = smov (!%p183_p9), 96  }
   0xf   : > { %s2051_s29 = smov (!%p183_p9), 32   ;;  %s212_s12 = sand.u32 (!%p183_p9), 1, %s2036_s16  }
  0x10   : > { %s1779_s14 = sshll.u32 (!%p183_p9), %s2098_s19, 3  ;;  %s2002_s9 = scalar_lea.hbm (!%p183_p9), %s2702_s4, 16 }
  0x13   : > { %v264_v0 = vld [vmem:[%s2701_s3 + $0x20] sm:$0xff]  ;;  %v230_v1 = vld [vmem:[%s2701_s3 + $0x8] sm:$0x3]  ;;  %vm237_vm0 = vcmask 1041408   ;;  %v2046_v3 = vmov 0   ;;  %s2136_s7 = scalar_select %p215_p10, %s2098_s19, 1  ;;  %v333_v60 = vlaneseq }
  0x14   : > { %v229_v2 = vld [vmem:[%s2701_s3] sm:$0xff]  ;;  %1829 = vset.pattern.permute.xlu0 %v2046_v3  ;;  %1716 = vmatpush.msk.msra.mxu0 %vm237_vm0, %v230_v1  ;;  %vm233_vm1 = vcmask 80896   ;;  %v265_v4 = vld [vmem:[%s2701_s3 + $0x28] sm:$0xff]  ;;  %vm291_vm2 = vcmask 64512   ;;  %v1881_v16 = vld [vmem:[%s2701_s3 + $0x10] ss:$0 sm:$0xff] }
  0x15   : > { %268 = vperm.xlu0 %1829, %v264_v0   ;;  %s1713_s8 = sshll.u32 %s2136_s7, 3  ;;  %s221_s13 = scalar_lea.vmem %s2699_s1, %s2136_s7  ;;  %vm355_vm3 = vcmask 261120   ;;  %v2047_v36 = vmov 32.0   ;;  %v418_v53 = vld [vmem:[%s2701_s3 + $0x98] sm:$0xff]  ;;  %v417_v54 = vld [vmem:[%s2701_s3 + $0x90] sm:$0xff]  ;;  %v416_v55 = vld [vmem:[%s2701_s3 + $0x88] sm:$0xff] }
  0x16   : > { %256 = vmatpush.msra.mxu0 %v229_v2  ;;  %s218_s22 = scalar_lea.vmem %s2698_s0, %s1713_s8  ;;  %v1880_v6 = vld [vmem:[%s221_s13] ss:$0 sm:$0xff]  ;;  %v2181_v61 = vand.u32 127, %v333_v60  ;;  %v2048_v3 = vmov 0.0   ;;  %s1712_s13 = sshll.u32 %s212_s12, 3 }
  0x17   : > { %v227_v5 = vld [vmem:[%s218_s22] sm:$0xff]  ;;  %s214_s30 = scalar_lea.vmem [#allocation2], %s1712_s13  ;;  %s1613_s19 = scalar_lea.sflag [#allocation3], %s212_s12 }
  0x18   : > { %1717 = vmatmul.msk.f32.vlgmr.msra.gmra.mxu0 %vm233_vm1, %v227_v5  ;;  %v415_v56 = vld [vmem:[%s2701_s3 + $0x80] sm:$0xff]  ;;  %vm340_vm5 = vcmp.ge.s32.totalorder %v2181_v61, 8  ;;  %vm341_vm6 = vcmp.lt.s32.totalorder %v2181_v61, 16  ;;  %vm336_vm14 = vcmp.lt.s32.totalorder %v2181_v61, 8  ;;  %vm345_vm15 = vcmp.ge.s32.totalorder %v2181_v61, 16  ;;  %s1625_s5 = sshll.u32 %s214_s30, 4  ;;  %s1626_s5 = int_to_ptr.vmem [resolvable:$true] %s1625_s5 }
  0x19   : > { %vm342_vm7 = vmand %vm340_vm5, %vm341_vm6  ;;  %vm346_vm0 = vcmp.lt.s32.totalorder %v2181_v61, 24  ;;  %vm351_vm5 = vcmp.lt.s32.totalorder %v2181_v61, 32 }
  0x1a   : > { %vm347_vm1 = vmand %vm345_vm15, %vm346_vm0 }
  0x1d   : > { %273 = vperm.xlu0 %1829, %v265_v4   ;;  %v2187_v4 = vsel %vm342_vm7, 1.0, %v2048_v3 }
  0x87   : > { %v269_v7 = vpop.permute.xlu0 %268 }
  0x88   : > { %v279_v8 = vsub.f32 %v269_v7, %v1880_v6 }
  0x8a   : > { %v281_v9 = vmul.f32 %v279_v8, %v279_v8 }
  0x8c   : > { %v285_v10 = vmul.f32 -2.0, %v281_v9 }
  0x8e   : > { %v287_v11 = vmul.f32 1.442695, %v285_v10 }
  0x8f   : > { %v274_v12 = vpop.permute.xlu0 %273 }
  0x90   : > { %1902 = vpow2.f32 %v287_v11  ;;  %v280_v13 = vsub.f32 %v274_v12, %v1880_v6  ;;  %v1882_v11 = vld [vmem:[%s2701_s3 + $0x70] ss:$0 sm:$0xff] }
  0x92   : > { %v282_v14 = vmul.f32 %v280_v13, %v280_v13 }
  0x94   : > { %v286_v15 = vmul.f32 -2.0, %v282_v14 }
  0x95   : > { %v258_v20 = vpop.f32.mrf.mxu0 }
  0x96   : > { %v1903_v17 = vpop.eup %1902  ;;  %v289_v18 = vmul.f32 1.442695, %v286_v15  ;;  %v259_v21 = vadd.f32 %v1881_v16, %v258_v20  ;;  %v1883_v15 = vld [vmem:[%s2701_s3 + $0x78] ss:$0 sm:$0xff] }
  0x97   : > { %v292_v19 = vsel %vm291_vm2, %v1903_v17, 0.0 }
  0x98   : > { %1904 = vpow2.f32 %v289_v18  ;;  %293 = vadd.xlane.f32.xlu1 %v292_v19  ;;  %319 = vmatpush.msra.mxu1 %v259_v21 }
  0x99   : > { %1783 = vmatpush.msra.mxu2 %v259_v21  ;;  %1718 = vmatmul.msk.f32.vlgmr.msra.gmra.mxu1 %vm291_vm2, %v1903_v17 }
  0x9b   : > { %439 = vmatpush.msrb.mxu2 %v418_v53 }
  0x9d   : > { %440 = vmatpush.msrb.mxu2 %v417_v54 }
  0x9e   : > { %v1905_v22 = vpop.eup %1904 }
  0x9f   : > { %1719 = vmatmul.msk.f32.vlgmr.msra.gmra.mxu2 %vm291_vm2, %v1905_v22  ;;  %v295_v23 = vsel %vm291_vm2, %v1905_v22, 0.0  ;;  %vm499_vm2 = vcmask 130048  }
  0xa0   : > { %296 = vadd.xlane.f32.xlu1 %v295_v23  ;;  %441 = vmatpush.msrb.mxu2 %v416_v55 }
  0xa2   : > { %442 = vmatpush.msrb.mxu2 %v415_v56  ;;  %v451_v56 = vld [vmem:[%s2701_s3 + $0x38] sm:$0xff] }
 0x10b   : > { %v294_v24 = vpop.xlane.xlu1 %293 }
 0x10c   : > { %v327_v25 = vadd.f32 1e-08, %v294_v24 }
 0x10e   : > { %1906 = vrcp.f32 %v327_v25  ;;  %v1884_v25 = vld [vmem:[%s2701_s3 + $0xa0] ss:$0 sm:$0xff] }
 0x113   : > { %v297_v26 = vpop.xlane.xlu1 %296 }
 0x114   : > { %v1907_v27 = vpop.eup %1906  ;;  %v328_v28 = vadd.f32 1e-08, %v297_v26 }
 0x116   : > { %v321_v29 = vpop.f32.mrf.mxu1  ;;  %1908 = vrcp.f32 %v328_v28 }
 0x117   : > { %v2152_v30 = vmul.f32 %v1907_v27, %v321_v29  ;;  %1910 = vrcp.f32 %v2047_v36 }
 0x119   : > { %v356_v31 = vsel %vm355_vm3, %v2152_v30, 0.0 }
 0x11a   : > { %357 = vadd.xlane.f32.xlu2 %v356_v31 }
 0x11c   : > { %v1909_v32 = vpop.eup %1908 }
 0x11d   : > { %v1911_v37 = vpop.eup %1910 }
 0x11e   : > { %v363_v38 = vmul.f32 32.0, %v1911_v37  ;;  %vm367_vm4 = vweird.f32 %v1911_v37 }
 0x120   : > { %v364_v39 = vsub.f32 1.0, %v363_v38 }
 0x122   : > { %v324_v33 = vpop.f32.mrf.mxu2  ;;  %v365_v40 = vmul.f32 %v1911_v37, %v364_v39  ;;  %v2245_v39 = vsel %vm347_vm1, 1.0, %v2048_v3 }
 0x123   : > { %v2156_v34 = vmul.f32 %v1909_v32, %v324_v33  ;;  %v2218_v32 = vsel %vm336_vm14, 1.0, %v2048_v3 }
 0x124   : > { %v366_v41 = vadd.f32 %v1911_v37, %v365_v40 }
 0x125   : > { %v359_v35 = vsel %vm355_vm3, %v2156_v34, 0.0 }
 0x126   : > { %360 = vadd.xlane.f32.xlu2 %v359_v35  ;;  %v2160_v42 = vsel %vm367_vm4, %v1911_v37, %v366_v41  ;;  %vm350_vm4 = vcmp.ge.s32.totalorder %v2181_v61, 24 }
 0x127   : > { %vm352_vm6 = vmand %vm350_vm4, %vm351_vm5 }
 0x18d   : > { %v358_v43 = vpop.xlane.xlu2 %357 }
 0x18e   : > { %v369_v44 = vmul.f32 %v2160_v42, %v358_v43  ;;  %v452_v43 = vld [vmem:[%s2701_s3 + $0x40] sm:$0xff] }
 0x190   : > { %v371_v45 = vsub.f32 %v2152_v30, %v369_v44 }
 0x192   : > { %v373_v46 = vmul.f32 %v371_v45, %v371_v45 }
 0x194   : > { %v375_v47 = vsel %vm355_vm3, %v373_v46, 0.0 }
 0x195   : > { %376 = vadd.xlane.f32.xlu0 %v375_v47  ;;  %v453_v47 = vld [vmem:[%s2701_s3 + $0x48] sm:$0xff] }
 0x199   : > { %v361_v48 = vpop.xlane.xlu2 %360 }
 0x19a   : > { %v370_v49 = vmul.f32 %v2160_v42, %v361_v48 }
 0x19c   : > { %v372_v50 = vsub.f32 %v2156_v34, %v370_v49 }
 0x19e   : > { %v374_v51 = vmul.f32 %v372_v50, %v372_v50 }
 0x1a0   : > { %v378_v52 = vsel %vm355_vm3, %v374_v51, 0.0 }
 0x1a1   : > { %379 = vadd.xlane.f32.xlu1 %v378_v52 }
 0x1a9   : > { %582 = vrot.lane.b32.xlu0 %v2187_v4, %s2049_s11 }
 0x208   : > { %v377_v57 = vpop.xlane.xlu0 %376 }
 0x209   : > { %v381_v58 = vmul.f32 %v377_v57, %v2160_v42 }
 0x20b   : > { %v383_v59 = vadd.f32 1e-05, %v381_v58 }
 0x20d   : > { %1912 = vrsqrt.f32 %v383_v59  ;;  %vm391_vm9 = vweird.f32 %v383_v59 }
 0x213   : > { %v1913_v0 = vpop.eup %1912 }
 0x214   : > { %v380_v62 = vpop.xlane.xlu1 %379  ;;  %v386_v1 = vmul.f32 %v1913_v0, %v383_v59  ;;  %vm392_vm8 = vweird.f32 %v1913_v0 }
 0x215   : > { %v382_v63 = vmul.f32 %v380_v62, %v2160_v42  ;;  %vm393_vm10 = vmor %vm391_vm9, %vm392_vm8 }
 0x216   : > { %v387_v5 = vmul.f32 %v1913_v0, %v386_v1 }
 0x217   : > { %v384_v2 = vadd.f32 1e-05, %v382_v63 }
 0x218   : > { %v388_v6 = vmul.f32 0.5, %v387_v5 }
 0x219   : > { %1914 = vrsqrt.f32 %v384_v2  ;;  %vm401_vm12 = vweird.f32 %v384_v2 }
 0x21a   : > { %v389_v7 = vsub.f32 1.5, %v388_v6 }
 0x21b   : > { %v583_v51 = vpop.permute.xlu0 %582 }
 0x21c   : > { %v390_v9 = vmul.f32 %v1913_v0, %v389_v7 }
 0x21e   : > { %v394_v12 = vsel %vm393_vm10, %v1913_v0, %v390_v9 }
 0x21f   : > { %v1915_v8 = vpop.eup %1914  ;;  %v405_v13 = vmul.f32 %v394_v12, %v371_v45 }
 0x220   : > { %v396_v10 = vmul.f32 %v1915_v8, %v384_v2  ;;  %vm402_vm11 = vweird.f32 %v1915_v8 }
 0x221   : > { %v409_v17 = vmul.f32 %v1882_v11, %v405_v13  ;;  %vm403_vm13 = vmor %vm401_vm12, %vm402_vm11 }
 0x222   : > { %v397_v14 = vmul.f32 %v1915_v8, %v396_v10 }
 0x223   : > { %v413_v19 = vadd.f32 %v1883_v15, %v409_v17  ;;  %v455_v17 = vld [vmem:[%s2701_s3 + $0x58] sm:$0xff] }
 0x224   : > { %v398_v16 = vmul.f32 0.5, %v397_v14 }
 0x225   : > { %1724 = vmatmul.msk.f32.vlgmr.msrb.gmra.mxu2 %vm355_vm3, %v413_v19 }
 0x226   : > { %v399_v18 = vsub.f32 1.5, %v398_v16  ;;  %v450_v16 = vld [vmem:[%s2701_s3 + $0x30] sm:$0xff] }
 0x228   : > { %v400_v20 = vmul.f32 %v1915_v8, %v399_v18 }
 0x22a   : > { %v404_v21 = vsel %vm403_vm13, %v1915_v8, %v400_v20  ;;  %vm1009_vm13 = vcmask 523264  }
 0x22b   : > { %v406_v22 = vmul.f32 %v404_v21, %v372_v50 }
 0x22d   : > { %v410_v23 = vmul.f32 %v1882_v11, %v406_v22  ;;  %v454_v11 = vld [vmem:[%s2701_s3 + $0x50] sm:$0xff] }
 0x22f   : > { %v414_v24 = vadd.f32 %v1883_v15, %v410_v23  ;;  %v2289_v23 = vsel %vm352_vm6, 1.0, %v2048_v3 }
 0x231   : > { %1725 = vmatmul.msk.f32.gmra.mxu2 %vm355_vm3, %v414_v24  ;;  %v1835_v24 = vpack.i.bf16 %v2289_v23, %v2218_v32 }
 0x2a8   : > { %v444_v26 = vpop.f32.mrf.mxu2 }
 0x2a9   : > { %v2202_v27 = vadd.f32 %v1884_v25, %v444_v26 }
 0x2ab   : > { %462 = vrot.lane.b32.xlu1 %v2202_v27, %s2050_s27  ;;  %v458_v35 = vmul.f32 %v2218_v32, %v2202_v27  ;;  %v528_v36 = vmul.f32 %v2187_v4, %v2202_v27  ;;  %v661_v40 = vmul.f32 %v2245_v39, %v2202_v27  ;;  %v585_v53 = vmul.f32 %v583_v51, %v2202_v27 }
 0x2b4   : > { %v447_v28 = vpop.f32.mrf.mxu2 }
 0x2b5   : > { %v2206_v29 = vadd.f32 %v1884_v25, %v447_v28 }
 0x2b7   : > { %464 = vrot.lane.b32.xlu2 %v2206_v29, %s2050_s27  ;;  %v459_v37 = vmul.f32 %v2218_v32, %v2206_v29  ;;  %v529_v38 = vmul.f32 %v2187_v4, %v2206_v29  ;;  %v662_v41 = vmul.f32 %v2245_v39, %v2206_v29  ;;  %v586_v52 = vmul.f32 %v583_v51, %v2206_v29 }
 0x2b9   : > { %v1830_v54 = vpack.i.bf16 %v585_v53, %v586_v52  ;;  %v760_v53 = vmul.f32 %v2289_v23, %v2206_v29 }
 0x311   : > { %v2210_v31 = vpop.permute.xlu2 %464 }
 0x312   : > { %1726 = vmatpush.xpose.msk.msra.mxu3 %vm355_vm3, %v2210_v31  ;;  %1730 = vmatpush.xpose.msk.msrb.mxu0 %vm355_vm3, %v2210_v31 }
 0x31d   : > { %v2220_v33 = vpop.permute.xlu1 %462 }
 0x31e   : > { %1727 = vmatpush.xpose.msk.msra.mxu3 %vm355_vm3, %v2220_v33  ;;  %1731 = vmatpush.xpose.msk.msrb.mxu0 %vm355_vm3, %v2220_v33 }
 0x321   : > { %1728 = vmatmul.msk.f32.vlgmr.msra.gmra.mxu3 %vm355_vm3, %v458_v35  ;;  %1732 = vmatmul.msk.f32.vlgmr.msrb.gmra.mxu0 %vm355_vm3, %v528_v36 }
 0x322   : > { %1738 = vmatpush.xpose.msk.msrb.mxu3 %vm355_vm3, %v2210_v31 }
 0x326   : > { %1739 = vmatpush.xpose.msk.msrb.mxu3 %vm355_vm3, %v2220_v33 }
 0x329   : > { %1729 = vmatmul.msk.f32.gmra.mxu3 %vm355_vm3, %v459_v37  ;;  %1733 = vmatmul.msk.f32.gmra.mxu0 %vm355_vm3, %v529_v38 }
 0x331   : > { %1740 = vmatmul.msk.f32.vlgmr.msrb.gmra.mxu3 %vm355_vm3, %v661_v40 }
 0x339   : > { %1741 = vmatmul.msk.f32.gmra.mxu3 %vm355_vm3, %v662_v41 }
 0x39e   : > { %v553_v44 = vpop.f32.mrf.mxu0 }
 0x39f   : > { %v554_v45 = vadd.f32 %v553_v44, %v452_v43 }
 0x3a1   : > { %v559_v46 = vsel %vm499_vm2, %v554_v45, -inf }
 0x3a2   : > { %560 = vmax.xlane.f32.xlu2 %v559_v46 }
 0x3a4   : > { %v493_v55 = vpop.f32.mrf.mxu3 }
 0x3a5   : > { %v494_v19 = vadd.f32 %v493_v55, %v450_v16 }
 0x3a6   : > { %v556_v48 = vpop.f32.mrf.mxu0 }
 0x3a7   : > { %v557_v49 = vadd.f32 %v556_v48, %v453_v47  ;;  %v500_v22 = vsel %vm499_vm2, %v494_v19, -inf }
 0x3a9   : > { %v562_v50 = vsel %vm499_vm2, %v557_v49, -inf }
 0x3aa   : > { %563 = vmax.xlane.f32.xlu1 %v562_v50 }
 0x3ac   : > { %v496_v57 = vpop.f32.mrf.mxu3 }
 0x3ad   : > { %v497_v58 = vadd.f32 %v496_v57, %v451_v56 }
 0x3af   : > { %v503_v59 = vsel %vm499_vm2, %v497_v58, -inf }
 0x3b4   : > { %v686_v7 = vpop.f32.mrf.mxu3 }
 0x3b5   : > { %v687_v12 = vadd.f32 %v686_v7, %v454_v11 }
 0x3b7   : > { %v692_v15 = vsel %vm499_vm2, %v687_v12, -inf }
 0x3ba   : > { %1831 = vrot.lane.b32.xlu2 %v1830_v54, %s2049_s11 }
 0x3bc   : > { %v689_v18 = vpop.f32.mrf.mxu3 }
 0x3bd   : > { %v690_v20 = vadd.f32 %v689_v18, %v455_v17 }
 0x3bf   : > { %v695_v21 = vsel %vm499_vm2, %v690_v20, -inf }
 0x3e3   : > { %504 = vmax.xlane.f32.xlu2 %v503_v59 }
 0x415   : > { %v561_v60 = vpop.xlane.xlu2 %560 }
 0x416   : > { %v565_v62 = vsub.f32 %v554_v45, %v561_v60  ;;  %v456_v60 = vld [vmem:[%s2701_s3 + $0x60] sm:$0xff] }
 0x418   : > { %v567_v63 = vmul.f32 1.442695, %v565_v62 }
 0x41a   : > { %1916 = vpow2.f32 %v567_v63 }
 0x41d   : > { %v564_v0 = vpop.xlane.xlu1 %563  ;;  %v1832_v1 = vpop.permute.xlu2 %1831 }
 0x41e   : > { %v566_v2 = vsub.f32 %v557_v49, %v564_v0  ;;  %v1833_v5 = vunpack.i.l.bf16 %v1832_v1  ;;  %v1834_v9 = vunpack.i.h.bf16 %v1832_v1  ;;  %v759_v49 = vmul.f32 %v2289_v23, %v2202_v27 }
 0x420   : > { %v1917_v6 = vpop.eup %1916  ;;  %v569_v8 = vmul.f32 1.442695, %v566_v2  ;;  %615 = vmatpush.msrb.mxu1 %v1833_v5  ;;  %v457_v5 = vld [vmem:[%s2701_s3 + $0x68] sm:$0xff] }
 0x421   : > { %v571_v10 = vsel %vm499_vm2, %v1917_v6, 0.0 }
 0x422   : > { %1918 = vpow2.f32 %v569_v8  ;;  %572 = vadd.xlane.f32.xlu0 %v571_v10  ;;  %616 = vmatpush.msrb.mxu1 %v1834_v9 }
 0x424   : > { %1744 = vmatpush.xpose.msk.msra.mxu1 %vm355_vm3, %v2210_v31 }
 0x428   : > { %1745 = vmatpush.xpose.msk.msra.mxu1 %vm355_vm3, %v2220_v33  ;;  %v1919_v13 = vpop.eup %1918 }
 0x429   : > { %v574_v14 = vsel %vm499_vm2, %v1919_v13, 0.0 }
 0x42a   : > { %575 = vadd.xlane.f32.xlu1 %v574_v14  ;;  %693 = vmax.xlane.f32.xlu0 %v692_v15 }
 0x432   : > { %696 = vmax.xlane.f32.xlu0 %v695_v21  ;;  %501 = vmax.xlane.f32.xlu1 %v500_v22 }
 0x44b   : > { %1836 = vrot.lane.b32.xlu1 %v1835_v24, %s2049_s11 }
 0x456   : > { %v505_v25 = vpop.xlane.xlu2 %504 }
 0x457   : > { %v507_v26 = vsub.f32 %v497_v58, %v505_v25 }
 0x459   : > { %v510_v28 = vmul.f32 1.442695, %v507_v26 }
 0x45b   : > { %1920 = vpow2.f32 %v510_v28 }
 0x461   : > { %v2294_v31 = vpop.eup %1920 }
 0x462   : > { %v515_v33 = vsel %vm499_vm2, %v2294_v31, 0.0 }
 0x463   : > { %516 = vadd.xlane.f32.xlu2 %v515_v33 }
 0x495   : > { %v573_v61 = vpop.xlane.xlu0 %572 }
 0x496   : > { %1922 = vrcp.f32 %v573_v61 }
 0x49c   : > { %v1923_v35 = vpop.eup %1922 }
 0x49d   : > { %v576_v3 = vpop.xlane.xlu1 %575  ;;  %v694_v36 = vpop.xlane.xlu0 %693  ;;  %v579_v37 = vmul.f32 %v1923_v35, %v1917_v6 }
 0x49e   : > { %1924 = vrcp.f32 %v576_v3  ;;  %v698_v38 = vsub.f32 %v687_v12, %v694_v36 }
 0x49f   : > { %1734 = vmatmul.msk.f32.vlgmr.msrb.gmra.mxu1 %vm499_vm2, %v579_v37 }
 0x4a0   : > { %v700_v40 = vmul.f32 1.442695, %v698_v38 }
 0x4a2   : > { %1926 = vpow2.f32 %v700_v40 }
 0x4a4   : > { %v1925_v41 = vpop.eup %1924 }
 0x4a5   : > { %v697_v43 = vpop.xlane.xlu0 %696  ;;  %v580_v44 = vmul.f32 %v1925_v41, %v1919_v13  ;;  %v502_v52 = vpop.xlane.xlu1 %501 }
 0x4a6   : > { %v699_v45 = vsub.f32 %v690_v20, %v697_v43  ;;  %v506_v0 = vsub.f32 %v494_v19, %v502_v52 }
 0x4a7   : > { %1735 = vmatmul.msk.f32.gmra.mxu1 %vm499_vm2, %v580_v44 }
 0x4a8   : > { %v2300_v46 = vpop.eup %1926  ;;  %v702_v47 = vmul.f32 1.442695, %v699_v45  ;;  %v508_v2 = vmul.f32 1.442695, %v506_v0 }
 0x4a9   : > { %v704_v48 = vsel %vm499_vm2, %v2300_v46, 0.0 }
 0x4aa   : > { %1928 = vpow2.f32 %v702_v47  ;;  %705 = vadd.xlane.f32.xlu2 %v704_v48 }
 0x4ab   : > { %1930 = vpow2.f32 %v508_v2  ;;  %v860_v2 = vld [vmem:[%s2701_s3 + $0xc0] sm:$0xff] }
 0x4ac   : > { %881 = vmatpush.msra.mxu3 %v860_v2 }
 0x4af   : > { %1746 = vmatmul.msk.f32.vlgmr.msra.gmra.mxu1 %vm355_vm3, %v759_v49 }
 0x4b0   : > { %v2307_v50 = vpop.eup %1928 }
 0x4b1   : > { %v707_v51 = vsel %vm499_vm2, %v2307_v50, 0.0  ;;  %v1931_v17 = vpop.eup %1930 }
 0x4b2   : > { %708 = vadd.xlane.f32.xlu2 %v707_v51  ;;  %v512_v18 = vsel %vm499_vm2, %v1931_v17, 0.0 }
 0x4b7   : > { %1747 = vmatmul.msk.f32.gmra.mxu1 %vm355_vm3, %v760_v53 }
 0x4bd   : > { %v1837_v54 = vpop.permute.xlu1 %1836 }
 0x4be   : > { %v1838_v55 = vunpack.i.l.bf16 %v1837_v54  ;;  %v1839_v7 = vunpack.i.h.bf16 %v1837_v54 }
 0x4c0   : > { %v527_v56 = vmul.f32 %v1838_v55, %v2206_v29  ;;  %v816_v13 = vmul.f32 %v1839_v7, %v2202_v27  ;;  %v817_v19 = vmul.f32 %v1839_v7, %v2206_v29  ;;  %v526_v20 = vmul.f32 %v1838_v55, %v2202_v27 }
 0x4c2   : > { %v1840_v57 = vpack.i.bf16 %v527_v56, %v2245_v39  ;;  %v1845_v21 = vpack.i.bf16 %v817_v19, %v526_v20 }
 0x4c4   : > { %1841 = vrot.lane.b32.xlu1 %v1840_v57, %s2049_s11 }
 0x4d6   : > { %v517_v36 = vpop.xlane.xlu2 %516 }
 0x51c   : > { %v2317_v58 = vpop.f32.mrf.mxu1 }
 0x51d   : > { %v706_v47 = vpop.xlane.xlu2 %705 }
 0x524   : > { %v2319_v59 = vpop.f32.mrf.mxu1 }
 0x525   : > { %v709_v49 = vpop.xlane.xlu2 %708 }
 0x52c   : > { %v784_v62 = vpop.f32.mrf.mxu1 }
 0x52d   : > { %v785_v63 = vadd.f32 %v784_v62, %v456_v60 }
 0x52f   : > { %v790_v1 = vsel %vm499_vm2, %v785_v63, -inf }
 0x530   : > { %791 = vmax.xlane.f32.xlu1 %v790_v1 }
 0x534   : > { %v787_v6 = vpop.f32.mrf.mxu1 }
 0x535   : > { %v788_v8 = vadd.f32 %v787_v6, %v457_v5  ;;  %v858_v5 = vld [vmem:[%s2701_s3 + $0xb0] sm:$0xff] }
 0x536   : > { %v1842_v9 = vpop.permute.xlu1 %1841 }
 0x537   : > { %v1844_v10 = vunpack.i.h.bf16 %v1842_v9  ;;  %v1843_v11 = vunpack.i.l.bf16 %v1842_v9  ;;  %v793_v12 = vsel %vm499_vm2, %v788_v8, -inf }
 0x538   : > { %794 = vmax.xlane.f32.xlu0 %v793_v12 }
 0x539   : > { %v718_v14 = vmul.f32 %v1843_v11, %v2202_v27  ;;  %v719_v15 = vmul.f32 %v1843_v11, %v2206_v29  ;;  %652 = vmatpush.msra.mxu2 %v1844_v10 }
 0x53b   : > { %722 = vrot.lane.b32.xlu2 %v718_v14, %s2049_s11  ;;  %v1850_v16 = vpack.i.bf16 %v719_v15, %v816_v13 }
 0x540   : > { %513 = vadd.xlane.f32.xlu0 %v512_v18  ;;  %v1885_v18 = vld [vmem:[%s2701_s3 + $0xc8] ss:$0 sm:$0xff] }
 0x549   : > { %1846 = vrot.lane.b32.xlu1 %v1845_v21, %s2049_s11 }
 0x595   : > { %v723_v60 = vpop.permute.xlu2 %722 }
 0x5a3   : > { %v792_v22 = vpop.xlane.xlu1 %791 }
 0x5a4   : > { %v796_v24 = vsub.f32 %v785_v63, %v792_v22 }
 0x5a6   : > { %v798_v25 = vmul.f32 1.442695, %v796_v24 }
 0x5a8   : > { %1932 = vpow2.f32 %v798_v25 }
 0x5ab   : > { %v795_v26 = vpop.xlane.xlu0 %794 }
 0x5ac   : > { %v797_v28 = vsub.f32 %v788_v8, %v795_v26 }
 0x5ae   : > { %v1933_v33 = vpop.eup %1932  ;;  %v800_v61 = vmul.f32 1.442695, %v797_v28 }
 0x5af   : > { %v802_v35 = vsel %vm499_vm2, %v1933_v33, 0.0 }
 0x5b0   : > { %1934 = vpow2.f32 %v800_v61  ;;  %803 = vadd.xlane.f32.xlu0 %v802_v35 }
 0x5b3   : > { %v514_v3 = vpop.xlane.xlu0 %513 }
 0x5b4   : > { %1936 = vrcp.f32 %v514_v3 }
 0x5b5   : > { %1938 = vrcp.f32 %v517_v36  ;;  %v949_v36 = vld [vmem:[%s2701_s3 + $0xf8] sm:$0xff] }
 0x5b6   : > { %v1935_v29 = vpop.eup %1934 }
 0x5b7   : > { %v805_v27 = vsel %vm499_vm2, %v1935_v29, 0.0 }
 0x5b8   : > { %806 = vadd.xlane.f32.xlu1 %v805_v27 }
 0x5ba   : > { %v1937_v37 = vpop.eup %1936 }
 0x5bb   : > { %v1847_v38 = vpop.permute.xlu1 %1846  ;;  %v520_v43 = vmul.f32 %v1937_v37, %v1931_v17  ;;  %v1939_v44 = vpop.eup %1938  ;;  %v948_v37 = vld [vmem:[%s2701_s3 + $0xf0] sm:$0xff] }
 0x5bc   : > { %v1849_v40 = vunpack.i.h.bf16 %v1847_v38  ;;  %v1848_v41 = vunpack.i.l.bf16 %v1847_v38  ;;  %v521_v45 = vmul.f32 %v1939_v44, %v2294_v31  ;;  %v947_v38 = vld [vmem:[%s2701_s3 + $0xe8] sm:$0xff] }
 0x5be   : > { %653 = vmatpush.msra.mxu2 %v1848_v41 }
 0x5bf   : > { %1736 = vmatmul.msk.f32.vlgmr.msra.gmra.mxu2 %vm499_vm2, %v520_v43 }
 0x5c0   : > { %846 = vmatpush.msrb.mxu2 %v1849_v40  ;;  %v946_v40 = vld [vmem:[%s2701_s3 + $0xe0] sm:$0xff] }
 0x5c4   : > { %1851 = vrot.lane.b32.xlu0 %v1850_v16, %s2049_s11  ;;  %s1782_s11 = sshll.u32 %s2136_s7, 5 }
 0x5c5   : > { %s2547_s6 = scalar_lea.vmem %s2700_s2, %s1782_s11  ;;  %s1623_s11 = scalar_lea.hbm %s2702_s4, %s1779_s14 }
 0x5c7   : > { %1737 = vmatmul.msk.f32.gmra.mxu2 %vm499_vm2, %v521_v45 }
 0x623   : > { %v804_v48 = vpop.xlane.xlu0 %803 }
 0x624   : > { %1940 = vrcp.f32 %v804_v48 }
 0x625   : > { %1942 = vrcp.f32 %v706_v47 }
 0x62a   : > { %v1941_v52 = vpop.eup %1940 }
 0x62b   : > { %v807_v51 = vpop.xlane.xlu1 %806  ;;  %v1943_v54 = vpop.eup %1942  ;;  %v810_v57 = vmul.f32 %v1941_v52, %v1933_v33 }
 0x62c   : > { %1944 = vrcp.f32 %v807_v51  ;;  %v712_v31 = vmul.f32 %v1943_v54, %v2300_v46  ;;  %v859_v46 = vld [vmem:[%s2701_s3 + $0xb8] sm:$0xff] }
 0x62d   : > { %1946 = vrcp.f32 %v709_v49  ;;  %882 = vmatpush.msra.mxu3 %v859_v46 }
 0x62f   : > { %883 = vmatpush.msra.mxu3 %v858_v5 }
 0x632   : > { %v1945_v62 = vpop.eup %1944 }
 0x633   : > { %v1947_v63 = vpop.eup %1946  ;;  %v811_v0 = vmul.f32 %v1945_v62, %v1935_v29 }
 0x634   : > { %v713_v1 = vmul.f32 %v1947_v63, %v2307_v50  ;;  %v857_v50 = vld [vmem:[%s2701_s3 + $0xa8] sm:$0xff] }
 0x635   : > { %884 = vmatpush.msra.mxu3 %v857_v50 }
 0x636   : > { %v1852_v53 = vpop.permute.xlu0 %1851 }
 0x637   : > { %v1854_v55 = vunpack.i.h.bf16 %v1852_v53  ;;  %v1853_v56 = vunpack.i.l.bf16 %v1852_v53 }
 0x639   : > { %748 = vmatpush.msra.mxu0 %v1854_v55  ;;  %847 = vmatpush.msrb.mxu2 %v1853_v56 }
 0x63a   : > { %1748 = vmatmul.msk.f32.vlgmr.msrb.gmra.mxu2 %vm499_vm2, %v810_v57 }
 0x63b   : > { %749 = vmatpush.msra.mxu0 %v723_v60 }
 0x63c   : > { %1742 = vmatmul.msk.f32.vlgmr.msra.gmra.mxu0 %vm499_vm2, %v712_v31  ;;  %v1886_v31 = vld [vmem:[%s2701_s3 + $0xd0] ss:$0 sm:$0xff] }
 0x63d   : > { %970 = vmatpush.msrb.mxu0 %v949_v36 }
 0x63f   : > { %971 = vmatpush.msrb.mxu0 %v948_v37 }
 0x641   : > { %972 = vmatpush.msrb.mxu0 %v947_v38 }
 0x642   : > { %1749 = vmatmul.msk.f32.gmra.mxu2 %vm499_vm2, %v811_v0  ;;  %v655_v6 = vpop.f32.mrf.mxu2  ;;  %v1887_v0 = vld [vmem:[%s2701_s3 + $0xd8] ss:$0 sm:$0xff] }
 0x643   : > { %v656_v9 = vadd.f32 %v655_v6, %v2317_v58  ;;  %973 = vmatpush.msrb.mxu0 %v946_v40 }
 0x644   : > { %1743 = vmatmul.msk.f32.gmra.mxu0 %vm499_vm2, %v713_v1 }
 0x64a   : > { %v658_v7 = vpop.f32.mrf.mxu2 }
 0x64b   : > { %v659_v14 = vadd.f32 %v658_v7, %v2319_v59 }
 0x6b9   : > { %v751_v8 = vpop.f32.mrf.mxu0 }
 0x6ba   : > { %v757_v10 = vadd.f32 %v751_v8, %v656_v9 }
 0x6bd   : > { %v849_v11 = vpop.f32.mrf.mxu2 }
 0x6be   : > { %v855_v12 = vadd.f32 %v849_v11, %v757_v10  ;;  %v1006_v10 = vld [vmem:[%s2701_s3 + $0x140] sm:$0xff]  ;;  %v1005_v11 = vld [vmem:[%s2701_s3 + $0x138] sm:$0xff] }
 0x6bf   : > { %1024 = vmatpush.msrb.mxu1 %v1006_v10  ;;  %v1151_v10 = vld [vmem:[%s2701_s3 + $0x1a0] sm:$0xff] }
 0x6c0   : > { %1750 = vmatmul.msk.f32.vlgmr.msra.gmra.mxu3 %vm355_vm3, %v855_v12  ;;  %v1004_v12 = vld [vmem:[%s2701_s3 + $0x130] sm:$0xff] }
 0x6c1   : > { %v754_v13 = vpop.f32.mrf.mxu0  ;;  %1025 = vmatpush.msrb.mxu1 %v1005_v11  ;;  %v1150_v11 = vld [vmem:[%s2701_s3 + $0x198] sm:$0xff] }
 0x6c2   : > { %v758_v15 = vadd.f32 %v754_v13, %v659_v14  ;;  %v1003_v13 = vld [vmem:[%s2701_s3 + $0x128] sm:$0xff]  ;;  %v1002_v14 = vld [vmem:[%s2701_s3 + $0x120] sm:$0xff] }
 0x6c3   : > { %1026 = vmatpush.msrb.mxu1 %v1004_v12  ;;  %v1124_v12 = vld [vmem:[%s2701_s3 + $0x188] sm:$0xff] }
 0x6c4   : > { %1142 = vmatpush.msra.mxu2 %v1124_v12 }
 0x6c5   : > { %v852_v16 = vpop.f32.mrf.mxu2  ;;  %1027 = vmatpush.msrb.mxu1 %v1003_v13 }
 0x6c6   : > { %v856_v17 = vadd.f32 %v852_v16, %v758_v15  ;;  %v1001_v15 = vld [vmem:[%s2701_s3 + $0x118] sm:$0xff]  ;;  %v1000_v16 = vld [vmem:[%s2701_s3 + $0x110] sm:$0xff] }
 0x6c7   : > { %1028 = vmatpush.msrb.mxu1 %v1002_v14  ;;  %v1123_v14 = vld [vmem:[%s2701_s3 + $0x180] sm:$0xff] }
 0x6c8   : > { %1751 = vmatmul.msk.f32.gmra.mxu3 %vm355_vm3, %v856_v17  ;;  %v999_v17 = vld [vmem:[%s2701_s3 + $0x108] sm:$0xff]  ;;  %1143 = vmatpush.msra.mxu2 %v1123_v14 }
 0x6c9   : > { %1029 = vmatpush.msrb.mxu1 %v1001_v15 }
 0x6cb   : > { %1030 = vmatpush.msrb.mxu1 %v1000_v16  ;;  %v1122_v16 = vld [vmem:[%s2701_s3 + $0x178] sm:$0xff] }
 0x6cc   : > { %1144 = vmatpush.msra.mxu2 %v1122_v16 }
 0x6cd   : > { %1031 = vmatpush.msrb.mxu1 %v999_v17  ;;  %v1121_v17 = vld [vmem:[%s2701_s3 + $0x170] sm:$0xff] }
 0x6ce   : > { %1145 = vmatpush.msra.mxu2 %v1121_v17 }
 0x743   : > { %v886_v19 = vpop.f32.mrf.mxu3 }
 0x744   : > { %v887_v20 = vadd.f32 %v1885_v18, %v886_v19 }
 0x746   : > { %v2369_v58 = vadd.f32 %v887_v20, %v2152_v30 }
 0x748   : > { %v894_v21 = vsel %vm355_vm3, %v2369_v58, 0.0 }
 0x749   : > { %895 = vadd.xlane.f32.xlu0 %v894_v21 }
 0x74b   : > { %v889_v22 = vpop.f32.mrf.mxu3 }
 0x74c   : > { %v890_v59 = vadd.f32 %v1885_v18, %v889_v22  ;;  %v1888_v18 = vld [vmem:[%s2701_s3 + $0x100] ss:$0 sm:$0xff] }
 0x74e   : > { %v2374_v24 = vadd.f32 %v890_v59, %v2156_v34 }
 0x750   : > { %v897_v25 = vsel %vm355_vm3, %v2374_v24, 0.0 }
 0x751   : > { %898 = vadd.xlane.f32.xlu2 %v897_v25 }
 0x7bc   : > { %v896_v26 = vpop.xlane.xlu0 %895 }
 0x7bd   : > { %v900_v28 = vmul.f32 %v896_v26, %v2160_v42 }
 0x7bf   : > { %v902_v33 = vsub.f32 %v2369_v58, %v900_v28 }
 0x7c1   : > { %v904_v30 = vmul.f32 %v902_v33, %v902_v33 }
 0x7c3   : > { %v906_v61 = vsel %vm355_vm3, %v904_v30, 0.0 }
 0x7c4   : > { %v899_v35 = vpop.xlane.xlu2 %898  ;;  %907 = vadd.xlane.f32.xlu1 %v906_v61 }
 0x7c5   : > { %v901_v3 = vmul.f32 %v899_v35, %v2160_v42 }
 0x7c7   : > { %v903_v29 = vsub.f32 %v2374_v24, %v901_v3 }
 0x7c9   : > { %v905_v34 = vmul.f32 %v903_v29, %v903_v29 }
 0x7cb   : > { %v909_v27 = vsel %vm355_vm3, %v905_v34, 0.0 }
 0x7cc   : > { %910 = vadd.xlane.f32.xlu1 %v909_v27 }
 0x837   : > { %v908_v41 = vpop.xlane.xlu1 %907 }
 0x838   : > { %v912_v43 = vmul.f32 %v908_v41, %v2160_v42 }
 0x83a   : > { %v914_v44 = vadd.f32 1e-05, %v912_v43 }
 0x83c   : > { %1948 = vrsqrt.f32 %v914_v44  ;;  %vm922_vm8 = vweird.f32 %v914_v44 }
 0x83f   : > { %v911_v45 = vpop.xlane.xlu1 %910 }
 0x840   : > { %v913_v47 = vmul.f32 %v911_v45, %v2160_v42 }
 0x842   : > { %v1949_v48 = vpop.eup %1948  ;;  %v915_v49 = vadd.f32 1e-05, %v913_v47 }
 0x843   : > { %v917_v51 = vmul.f32 %v1949_v48, %v914_v44  ;;  %vm923_vm7 = vweird.f32 %v1949_v48  ;;  %v1889_v44 = vld [vmem:[%s2701_s3 + $0x148] ss:$0 sm:$0xff] }
 0x844   : > { %1950 = vrsqrt.f32 %v915_v49  ;;  %vm924_vm9 = vmor %vm922_vm8, %vm923_vm7  ;;  %vm932_vm11 = vweird.f32 %v915_v49 }
 0x845   : > { %v918_v52 = vmul.f32 %v1949_v48, %v917_v51  ;;  %v2443_v51 = vld [vmem:[%s2701_s3 + $0x18] ss:$0 sm:$0xff] }
 0x847   : > { %v919_v53 = vmul.f32 0.5, %v918_v52 }
 0x849   : > { %v920_v54 = vsub.f32 1.5, %v919_v53 }
 0x84a   : > { %v1951_v55 = vpop.eup %1950 }
 0x84b   : > { %v921_v56 = vmul.f32 %v1949_v48, %v920_v54  ;;  %v927_v57 = vmul.f32 %v1951_v55, %v915_v49  ;;  %vm933_vm10 = vweird.f32 %v1951_v55  ;;  %v1041_v54 = vsel %vm355_vm3, %v2443_v51, 0.0 }
 0x84c   : > { %vm934_vm12 = vmor %vm932_vm11, %vm933_vm10 }
 0x84d   : > { %v925_v60 = vsel %vm924_vm9, %v1949_v48, %v921_v56  ;;  %v928_v62 = vmul.f32 %v1951_v55, %v927_v57 }
 0x84e   : > { %v936_v63 = vmul.f32 %v925_v60, %v902_v33 }
 0x84f   : > { %v929_v1 = vmul.f32 0.5, %v928_v62 }
 0x850   : > { %v940_v2 = vmul.f32 %v1886_v31, %v936_v63 }
 0x851   : > { %v930_v46 = vsub.f32 1.5, %v929_v1 }
 0x852   : > { %v944_v5 = vadd.f32 %v1887_v0, %v940_v2 }
 0x853   : > { %v931_v50 = vmul.f32 %v1951_v55, %v930_v46 }
 0x854   : > { %1752 = vmatmul.msk.f32.vlgmr.msrb.gmra.mxu0 %vm355_vm3, %v944_v5 }
 0x855   : > { %v935_v6 = vsel %vm934_vm12, %v1951_v55, %v931_v50 }
 0x856   : > { %v937_v7 = vmul.f32 %v935_v6, %v903_v29 }
 0x858   : > { %v941_v8 = vmul.f32 %v1886_v31, %v937_v7 }
 0x85a   : > { %v945_v9 = vadd.f32 %v1887_v0, %v941_v8  ;;  %v1153_v8 = vld [vmem:[%s2701_s3 + $0x1b0] sm:$0xff] }
 0x85b   : > { %1174 = vmatpush.msrb.mxu3 %v1153_v8 }
 0x85c   : > { %1753 = vmatmul.msk.f32.gmra.mxu0 %vm355_vm3, %v945_v9  ;;  %v1152_v9 = vld [vmem:[%s2701_s3 + $0x1a8] sm:$0xff] }
 0x85d   : > { %1175 = vmatpush.msrb.mxu3 %v1152_v9 }
 0x85f   : > { %1176 = vmatpush.msrb.mxu3 %v1151_v10 }
 0x861   : > { %1177 = vmatpush.msrb.mxu3 %v1150_v11 }
 0x8d1   : > { %v975_v19 = vpop.f32.mrf.mxu0 }
 0x8d2   : > { %v976_v20 = vadd.f32 %v1888_v18, %v975_v19 }
 0x8d4   : > { %v981_v21 = vmul.f32 %v976_v20, %v976_v20 }
 0x8d6   : > { %v983_v22 = vmul.f32 %v981_v21, %v976_v20 }
 0x8d8   : > { %v985_v59 = vmul.f32 0.044715, %v983_v22 }
 0x8d9   : > { %v978_v25 = vpop.f32.mrf.mxu0 }
 0x8da   : > { %v987_v26 = vadd.f32 %v985_v59, %v976_v20  ;;  %v979_v28 = vadd.f32 %v1888_v18, %v978_v25 }
 0x8dc   : > { %v989_v33 = vmul.f32 0.7978846, %v987_v26  ;;  %v982_v30 = vmul.f32 %v979_v28, %v979_v28 }
 0x8de   : > { %1952 = vtanh.f32 %v989_v33  ;;  %v984_v61 = vmul.f32 %v982_v30, %v979_v28 }
 0x8e0   : > { %v986_v35 = vmul.f32 0.044715, %v984_v61 }
 0x8e2   : > { %v988_v3 = vadd.f32 %v986_v35, %v979_v28 }
 0x8e4   : > { %v1953_v29 = vpop.eup %1952  ;;  %v990_v34 = vmul.f32 0.7978846, %v988_v3 }
 0x8e5   : > { %v993_v27 = vadd.f32 1.0, %v1953_v29 }
 0x8e6   : > { %1954 = vtanh.f32 %v990_v34 }
 0x8e7   : > { %v995_v36 = vmul.f32 0.5, %v993_v27  ;;  %v1891_v27 = vld [vmem:[%s2701_s3 + $0x160] ss:$0 sm:$0xff] }
 0x8e9   : > { %v997_v37 = vmul.f32 %v995_v36, %v976_v20 }
 0x8eb   : > { %1754 = vmatmul.msk.f32.vlgmr.msrb.gmra.mxu1 %vm1009_vm13, %v997_v37 }
 0x8ec   : > { %v1955_v38 = vpop.eup %1954 }
 0x8ed   : > { %v994_v40 = vadd.f32 1.0, %v1955_v38 }
 0x8ef   : > { %v996_v41 = vmul.f32 0.5, %v994_v40 }
 0x8f1   : > { %v998_v43 = vmul.f32 %v996_v41, %v979_v28 }
 0x8f3   : > { %1755 = vmatmul.msk.f32.gmra.mxu1 %vm1009_vm13, %v998_v43  ;;  %v1893_v43 = vld [vmem:[%s2701_s3 + $0x168] ss:$0 sm:$0xff] }
 0x968   : > { %v1033_v45 = vpop.f32.mrf.mxu1 }
 0x969   : > { %v1034_v47 = vadd.f32 %v1889_v44, %v1033_v45 }
 0x96b   : > { %v1039_v48 = vadd.f32 %v1034_v47, %v2369_v58 }
 0x96d   : > { %v1069_v49 = vsel %vm355_vm3, %v1039_v48, 0.0 }
 0x96e   : > { %1070 = vadd.xlane.f32.xlu1 %v1069_v49 }
 0x970   : > { %v1036_v52 = vpop.f32.mrf.mxu1 }
 0x971   : > { %v1037_v53 = vadd.f32 %v1889_v44, %v1036_v52 }
 0x973   : > { %v1040_v55 = vadd.f32 %v1037_v53, %v2374_v24 }
 0x975   : > { %v1072_v56 = vsel %vm355_vm3, %v1040_v55, 0.0 }
 0x976   : > { %1042 = vadd.xlane.f32.xlu1 %v1041_v54  ;;  %1073 = vadd.xlane.f32.xlu0 %v1072_v56  ;;  %v1892_v54 = vld [vmem:[%s2701_s3 + $0x150] ss:$0 sm:$0xff] }
 0x9e1   : > { %v1071_v58 = vpop.xlane.xlu1 %1070 }
 0x9e2   : > { %v1075_v57 = vmul.f32 %v1071_v58, %v2160_v42 }
 0x9e4   : > { %v1077_v31 = vsub.f32 %v1039_v48, %v1075_v57 }
 0x9e6   : > { %v1079_v60 = vmul.f32 %v1077_v31, %v1077_v31 }
 0x9e8   : > { %v1081_v62 = vsel %vm355_vm3, %v1079_v60, 0.0 }
 0x9e9   : > { %v1074_v63 = vpop.xlane.xlu0 %1073  ;;  %1082 = vadd.xlane.f32.xlu0 %v1081_v62  ;;  %v1043_v0 = vpop.xlane.xlu1 %1042 }
 0x9ea   : > { %v1076_v1 = vmul.f32 %v1074_v63, %v2160_v42  ;;  %v1044_v2 = vmul.f32 %v1043_v0, %v2160_v42 }
 0x9ec   : > { %v2453_v46 = vsub.f32 %v1040_v55, %v1076_v1  ;;  %v2456_v24 = vsub.f32 %v2443_v51, %v1044_v2 }
 0x9ee   : > { %v1080_v5 = vmul.f32 %v2453_v46, %v2453_v46  ;;  %v1046_v50 = vmul.f32 %v2456_v24, %v2456_v24 }
 0x9f0   : > { %v1084_v6 = vsel %vm355_vm3, %v1080_v5, 0.0  ;;  %v1047_v7 = vsel %vm355_vm3, %v1046_v50, 0.0  ;;  %v1896_v5 = vld [vmem:[%s2701_s3 + $0x190] ss:$0 sm:$0xff] }
 0x9f1   : > { %1085 = vadd.xlane.f32.xlu1 %v1084_v6  ;;  %1048 = vadd.xlane.f32.xlu2 %v1047_v7 }
 0xa0a   : > { %1270 = vrot.lane.b32.xlu1 %v2187_v4, %s2051_s29 }
 0xa5c   : > { %v1083_v13 = vpop.xlane.xlu0 %1082 }
 0xa5d   : > { %v1087_v15 = vmul.f32 %v1083_v13, %v2160_v42 }
 0xa5f   : > { %v1089_v18 = vadd.f32 1e-05, %v1087_v15 }
 0xa61   : > { %1956 = vrsqrt.f32 %v1089_v18  ;;  %vm1097_vm15 = vweird.f32 %v1089_v18 }
 0xa64   : > { %v1049_v19 = vpop.xlane.xlu2 %1048  ;;  %v1086_v20 = vpop.xlane.xlu1 %1085 }
 0xa65   : > { %v1050_v21 = vmul.f32 %v1049_v19, %v2160_v42  ;;  %v1088_v22 = vmul.f32 %v1086_v20, %v2160_v42  ;;  %v1860_v19 = vpack.i.bf16 %v2245_v39, %v2218_v32 }
 0xa67   : > { %v1957_v59 = vpop.eup %1956  ;;  %v1051_v25 = vadd.f32 1e-05, %v1050_v21  ;;  %v1090_v26 = vadd.f32 1e-05, %v1088_v22 }
 0xa68   : > { %v1092_v28 = vmul.f32 %v1957_v59, %v1089_v18  ;;  %vm1098_vm14 = vweird.f32 %v1957_v59 }
 0xa69   : > { %1958 = vrsqrt.f32 %v1051_v25  ;;  %vm1099_vm0 = vmor %vm1097_vm15, %vm1098_vm14  ;;  %vm1058_vm5 = vweird.f32 %v1051_v25  ;;  %vm1107_vm7 = vweird.f32 %v1090_v26 }
 0xa6a   : > { %v1093_v33 = vmul.f32 %v1957_v59, %v1092_v28  ;;  %1960 = vrsqrt.f32 %v1090_v26 }
 0xa6c   : > { %v1094_v30 = vmul.f32 0.5, %v1093_v33 }
 0xa6e   : > { %v1095_v61 = vsub.f32 1.5, %v1094_v30 }
 0xa6f   : > { %v1959_v35 = vpop.eup %1958 }
 0xa70   : > { %v1961_v3 = vpop.eup %1960  ;;  %v1096_v29 = vmul.f32 %v1957_v59, %v1095_v61  ;;  %v1053_v34 = vmul.f32 %v1959_v35, %v1051_v25  ;;  %vm1059_vm1 = vweird.f32 %v1959_v35 }
 0xa71   : > { %v1102_v36 = vmul.f32 %v1961_v3, %v1090_v26  ;;  %vm1108_vm4 = vweird.f32 %v1961_v3  ;;  %vm1060_vm6 = vmor %vm1058_vm5, %vm1059_vm1  ;;  %v1185_v26 = vld [vmem:[%s2547_s6] sm:$0xff] }
 0xa72   : > { %v1100_v37 = vsel %vm1099_vm0, %v1957_v59, %v1096_v29  ;;  %v1054_v38 = vmul.f32 %v1959_v35, %v1053_v34  ;;  %vm1109_vm8 = vmor %vm1107_vm7, %vm1108_vm4 }
 0xa73   : > { %v1111_v40 = vmul.f32 %v1100_v37, %v1077_v31  ;;  %v1103_v41 = vmul.f32 %v1961_v3, %v1102_v36  ;;  %v1894_v31 = vld [vmem:[%s2701_s3 + $0x158] ss:$0 sm:$0xff] }
 0xa74   : > { %v1055_v44 = vmul.f32 0.5, %v1054_v38 }
 0xa75   : > { %v1115_v45 = vmul.f32 %v1891_v27, %v1111_v40  ;;  %v1104_v47 = vmul.f32 0.5, %v1103_v41 }
 0xa76   : > { %v1056_v48 = vsub.f32 1.5, %v1055_v44 }
 0xa77   : > { %v1105_v49 = vsub.f32 1.5, %v1104_v47  ;;  %v1119_v52 = vadd.f32 %v1893_v43, %v1115_v45 }
 0xa78   : > { %v1057_v53 = vmul.f32 %v1959_v35, %v1056_v48 }
 0xa79   : > { %v1106_v55 = vmul.f32 %v1961_v3, %v1105_v49  ;;  %1757 = vmatmul.msk.f32.vlgmr.msrb.gmra.mxu3 %vm355_vm3, %v1119_v52 }
 0xa7a   : > { %v1061_v56 = vsel %vm1060_vm6, %v1959_v35, %v1057_v53 }
 0xa7b   : > { %v1062_v58 = vmul.f32 %v1061_v56, %v2456_v24  ;;  %v1110_v57 = vsel %vm1109_vm8, %v1961_v3, %v1106_v55  ;;  %v1895_v24 = vld [vmem:[%s2701_s3 + $0x1b8] ss:$0 sm:$0xff]  ;;  %v1187_v3 = vld [vmem:[%s2547_s6 + $0x10] sm:$0xff] }
 0xa7c   : > { %v1112_v60 = vmul.f32 %v1110_v57, %v2453_v46  ;;  %v1271_v15 = vpop.permute.xlu1 %1270 }
 0xa7d   : > { %v1065_v62 = vmul.f32 %v1892_v54, %v1062_v58 }
 0xa7e   : > { %v1116_v63 = vmul.f32 %v1891_v27, %v1112_v60 }
 0xa7f   : > { %v1068_v0 = vadd.f32 %v1894_v31, %v1065_v62  ;;  %v1188_v62 = vld [vmem:[%s2547_s6 + $0x18] sm:$0xff] }
 0xa80   : > { %v1120_v1 = vadd.f32 %v1893_v43, %v1116_v63 }
 0xa81   : > { %1756 = vmatmul.msk.f32.vlgmr.msra.gmra.mxu2 %vm355_vm3, %v1068_v0 }
 0xa82   : > { %1758 = vmatmul.msk.f32.gmra.mxu3 %vm355_vm3, %v1120_v1 }
 0xafc   : > { %v1179_v2 = vpop.f32.mrf.mxu3 }
 0xafd   : > { %v2524_v8 = vadd.f32 %v1895_v24, %v1179_v2 }
 0xaff   : > { %v1273_v17 = vmul.f32 %v1271_v15, %v2524_v8 }
 0xb04   : > { %v1147_v6 = vpop.f32.mrf.mxu2 }
 0xb05   : > { %v1182_v50 = vpop.f32.mrf.mxu3  ;;  %v2522_v7 = vadd.f32 %v1896_v5, %v1147_v6 }
 0xb06   : > { %v2516_v46 = vadd.f32 %v1895_v24, %v1182_v50 }
 0xb07   : > { %v1189_v9 = vmul.f32 %v2218_v32, %v2522_v7  ;;  %v1235_v10 = vmul.f32 %v2187_v4, %v2522_v7  ;;  %v1337_v11 = vmul.f32 %v2245_v39, %v2522_v7  ;;  %v1186_v4 = vld [vmem:[%s2547_s6 + $0x8] sm:$0xff]  ;;  %v1409_v52 = vmul.f32 %v2289_v23, %v2522_v7  ;;  %s1627_s6 = sshll.u32 %s1623_s11, 4  ;;  %s1628_s6 = int_to_ptr.hbm [resolvable:$true] %s1627_s6 }
 0xb08   : > { %1759 = vmatpush.xpose.msk.msra.mxu0 %vm355_vm3, %v2516_v46  ;;  %1762 = vmatpush.xpose.msk.msrb.mxu2 %vm355_vm3, %v2516_v46  ;;  %v1274_v16 = vmul.f32 %v1271_v15, %v2516_v46  ;;  %s1996_s7 = sshra.s32 %s1628_s6, 4  ;;  %s1997_s7 = int_to_ptr.hbm [resolvable:$true] %s1996_s7 }
 0xb09   : > { %p2003_p0 = scmp.lt.s32.totalorder %s1997_s7, %s2702_s4 }
 0xb0a   : > { %v1855_v18 = vpack.i.bf16 %v1273_v17, %v1274_v16 }
 0xb0c   : > { %1760 = vmatpush.xpose.msk.msra.mxu0 %vm355_vm3, %v2524_v8  ;;  %1763 = vmatpush.xpose.msk.msrb.mxu2 %vm355_vm3, %v2524_v8 }
 0xb0f   : > { %1761 = vmatmul.msk.f32.vlgmr.msra.gmra.mxu0 %vm355_vm3, %v1189_v9  ;;  %1764 = vmatmul.msk.f32.vlgmr.msrb.gmra.mxu2 %vm355_vm3, %v1235_v10 }
 0xb10   : > { %1767 = vmatpush.xpose.msk.msra.mxu2 %vm355_vm3, %v2516_v46 }
 0xb14   : > { %1768 = vmatpush.xpose.msk.msra.mxu2 %vm355_vm3, %v2524_v8 }
 0xb17   : > { %1769 = vmatmul.msk.f32.vlgmr.msra.gmra.mxu2 %vm355_vm3, %v1337_v11 }
 0xb8c   : > { %v1216_v28 = vpop.f32.mrf.mxu0 }
 0xb8d   : > { %v1217_v33 = vadd.f32 %v1216_v28, %v1185_v26 }
 0xb8f   : > { %v1219_v35 = vsel %vm499_vm2, %v1217_v33, -inf }
 0xb92   : > { %v1256_v12 = vpop.f32.mrf.mxu2 }
 0xb93   : > { %v1257_v13 = vadd.f32 %v1256_v12, %v1186_v4 }
 0xb95   : > { %v1259_v14 = vsel %vm499_vm2, %v1257_v13, -inf }
 0xb96   : > { %1260 = vmax.xlane.f32.xlu0 %v1259_v14 }
 0xb9a   : > { %v1358_v29 = vpop.f32.mrf.mxu2 }
 0xb9b   : > { %v1359_v39 = vadd.f32 %v1358_v29, %v1187_v3  ;;  %v1482_v3 = vld [vmem:[%s2701_s3 + $0x1c8] sm:$0xff]  ;;  %v1481_v29 = vld [vmem:[%s2701_s3 + $0x1c0] sm:$0xff] }
 0xb9d   : > { %v1361_v37 = vsel %vm499_vm2, %v1359_v39, -inf }
 0xbaa   : > { %1856 = vrot.lane.b32.xlu0 %v1855_v18, %s2050_s27 }
 0xbb2   : > { %1861 = vrot.lane.b32.xlu0 %v1860_v19, %s2051_s29 }
 0xc09   : > { %v1261_v20 = vpop.xlane.xlu0 %1260 }
 0xc0a   : > { %v1262_v21 = vsub.f32 %v1257_v13, %v1261_v20 }
 0xc0c   : > { %v1263_v22 = vmul.f32 1.442695, %v1262_v21 }
 0xc0e   : > { %1962 = vpow2.f32 %v1263_v22 }
 0xc14   : > { %v1963_v59 = vpop.eup %1962 }
 0xc15   : > { %v1265_v25 = vsel %vm499_vm2, %v1963_v59, 0.0 }
 0xc16   : > { %1266 = vadd.xlane.f32.xlu2 %v1265_v25 }
 0xc1c   : > { %v1857_v30 = vpop.permute.xlu0 %1856 }
 0xc1d   : > { %v1858_v61 = vunpack.i.l.bf16 %v1857_v30  ;;  %v1859_v32 = vunpack.i.h.bf16 %v1857_v30 }
 0xc1e   : > { %1220 = vmax.xlane.f32.xlu2 %v1219_v35  ;;  %v1483_v35 = vld [vmem:[%s2701_s3 + $0x1d0] sm:$0xff] }
 0xc1f   : > { %1300 = vmatpush.msra.mxu1 %v1858_v61  ;;  %v1484_v61 = vld [vmem:[%s2701_s3 + $0x1d8] sm:$0xff] }
 0xc20   : > { %1502 = vmatpush.msrb.mxu2 %v1484_v61 }
 0xc21   : > { %1301 = vmatpush.msra.mxu1 %v1859_v32 }
 0xc22   : > { %1503 = vmatpush.msrb.mxu2 %v1483_v35 }
 0xc23   : > { %1771 = vmatpush.xpose.msk.msrb.mxu1 %vm355_vm3, %v2516_v46 }
 0xc24   : > { %v1862_v34 = vpop.permute.xlu0 %1861  ;;  %1504 = vmatpush.msrb.mxu2 %v1482_v3 }
 0xc25   : > { %v1864_v27 = vunpack.i.h.bf16 %v1862_v34  ;;  %v1863_v36 = vunpack.i.l.bf16 %v1862_v34 }
 0xc26   : > { %1362 = vmax.xlane.f32.xlu2 %v1361_v37  ;;  %1505 = vmatpush.msrb.mxu2 %v1481_v29 }
 0xc27   : > { %1772 = vmatpush.xpose.msk.msrb.mxu1 %vm355_vm3, %v2524_v8  ;;  %v1375_v38 = vmul.f32 %v1864_v27, %v2524_v8  ;;  %v1233_v40 = vmul.f32 %v1863_v36, %v2524_v8  ;;  %v1376_v1 = vmul.f32 %v1864_v27, %v2516_v46  ;;  %v1234_v2 = vmul.f32 %v1863_v36, %v2516_v46 }
 0xc29   : > { %v1870_v41 = vpack.i.bf16 %v1375_v38, %v1233_v40  ;;  %v1865_v24 = vpack.i.bf16 %v1376_v1, %v1234_v2  ;;  %v1897_v38 = vld [vmem:[%s2701_s3 + $0x1e0] ss:$0 sm:$0xff]  ;;  %v1898_v1 = vld [vmem:[%s2701_s3 + $0x1e8] ss:$0 sm:$0xff] }
 0xc3e   : > { %1444 = vrot.lane.b32.xlu2 %v2289_v23, %s2051_s29 }
 0xc89   : > { %v1267_v43 = vpop.xlane.xlu2 %1266 }
 0xc8a   : > { %1964 = vrcp.f32 %v1267_v43 }
 0xc90   : > { %v1965_v44 = vpop.eup %1964 }
 0xc91   : > { %v1269_v45 = vmul.f32 %v1965_v44, %v1963_v59  ;;  %v1221_v47 = vpop.xlane.xlu2 %1220 }
 0xc92   : > { %v1222_v48 = vsub.f32 %v1217_v33, %v1221_v47 }
 0xc93   : > { %1765 = vmatmul.msk.f32.vlgmr.msra.gmra.mxu1 %vm499_vm2, %v1269_v45 }
 0xc94   : > { %v1223_v49 = vmul.f32 1.442695, %v1222_v48 }
 0xc96   : > { %1966 = vpow2.f32 %v1223_v49 }
 0xc99   : > { %v1363_v53 = vpop.xlane.xlu2 %1362 }
 0xc9a   : > { %v1364_v54 = vsub.f32 %v1359_v39, %v1363_v53  ;;  %v1542_v53 = vld [vmem:[%s2701_s3 + $0x210] sm:$0xff] }
 0xc9b   : > { %1773 = vmatmul.msk.f32.vlgmr.msrb.gmra.mxu1 %vm355_vm3, %v1409_v52 }
 0xc9c   : > { %v1967_v55 = vpop.eup %1966  ;;  %v1365_v56 = vmul.f32 1.442695, %v1364_v54  ;;  %v1540_v54 = vld [vmem:[%s2701_s3 + $0x200] sm:$0xff] }
 0xc9d   : > { %v1225_v58 = vsel %vm499_vm2, %v1967_v55, 0.0 }
 0xc9e   : > { %1968 = vpow2.f32 %v1365_v56  ;;  %1226 = vadd.xlane.f32.xlu0 %v1225_v58 }
 0xca1   : > { %v1445_v5 = vpop.permute.xlu2 %1444 }
 0xca2   : > { %v1447_v50 = vmul.f32 %v1445_v5, %v2524_v8  ;;  %v1448_v6 = vmul.f32 %v1445_v5, %v2516_v46 }
 0xca4   : > { %v1969_v57 = vpop.eup %1968  ;;  %v1875_v7 = vpack.i.bf16 %v1447_v50, %v1448_v6  ;;  %v1584_v6 = vld [vmem:[%s2701_s3 + $0x258] sm:$0xff] }
 0xca5   : > { %v1367_v31 = vsel %vm499_vm2, %v1969_v57, 0.0  ;;  %1598 = vmatpush.msra.mxu1 %v1584_v6 }
 0xca6   : > { %1368 = vadd.xlane.f32.xlu2 %v1367_v31 }
 0xd10   : > { %v1303_v60 = vpop.f32.mrf.mxu1 }
 0xd11   : > { %v1227_v8 = vpop.xlane.xlu0 %1226 }
 0xd18   : > { %v1430_v63 = vpop.f32.mrf.mxu1 }
 0xd19   : > { %v1431_v0 = vadd.f32 %v1430_v63, %v1188_v62  ;;  %v1369_v46 = vpop.xlane.xlu2 %1368 }
 0xd1b   : > { %v1433_v23 = vsel %vm499_vm2, %v1431_v0, -inf }
 0xd1c   : > { %1434 = vmax.xlane.f32.xlu1 %v1433_v23 }
 0xd35   : > { %1866 = vrot.lane.b32.xlu1 %v1865_v24, %s2050_s27 }
 0xd3d   : > { %1876 = vrot.lane.b32.xlu1 %v1875_v7, %s2050_s27  ;;  %v1583_v7 = vld [vmem:[%s2701_s3 + $0x250] sm:$0xff] }
 0xd3e   : > { %1599 = vmatpush.msra.mxu1 %v1583_v7 }
 0xd8f   : > { %v1435_v9 = vpop.xlane.xlu1 %1434 }
 0xd90   : > { %v1436_v10 = vsub.f32 %v1431_v0, %v1435_v9  ;;  %v1582_v9 = vld [vmem:[%s2701_s3 + $0x248] sm:$0xff] }
 0xd91   : > { %1600 = vmatpush.msra.mxu1 %v1582_v9 }
 0xd92   : > { %v1437_v11 = vmul.f32 1.442695, %v1436_v10  ;;  %v1581_v10 = vld [vmem:[%s2701_s3 + $0x240] sm:$0xff] }
 0xd93   : > { %1601 = vmatpush.msra.mxu1 %v1581_v10 }
 0xd94   : > { %1970 = vpow2.f32 %v1437_v11  ;;  %v1580_v11 = vld [vmem:[%s2701_s3 + $0x238] sm:$0xff] }
 0xd95   : > { %1972 = vrcp.f32 %v1227_v8  ;;  %1602 = vmatpush.msra.mxu1 %v1580_v11 }
 0xd96   : > { %1974 = vrcp.f32 %v1369_v46 }
 0xd9a   : > { %v1971_v4 = vpop.eup %1970 }
 0xd9b   : > { %v1439_v12 = vsel %vm499_vm2, %v1971_v4, 0.0  ;;  %v1973_v17 = vpop.eup %1972 }
 0xd9c   : > { %1440 = vadd.xlane.f32.xlu0 %v1439_v12  ;;  %v1975_v18 = vpop.eup %1974  ;;  %v1229_v59 = vmul.f32 %v1973_v17, %v1967_v55  ;;  %v1539_v55 = vld [vmem:[%s2701_s3 + $0x1f8] sm:$0xff]  ;;  %v1578_v12 = vld [vmem:[%s2701_s3 + $0x228] sm:$0xff] }
 0xd9d   : > { %v1371_v25 = vmul.f32 %v1975_v18, %v1969_v57 }
 0xda7   : > { %v1867_v13 = vpop.permute.xlu1 %1866 }
 0xda8   : > { %v1869_v14 = vunpack.i.h.bf16 %v1867_v13  ;;  %v1868_v15 = vunpack.i.l.bf16 %v1867_v13  ;;  %v1577_v13 = vld [vmem:[%s2701_s3 + $0x220] sm:$0xff] }
 0xdaa   : > { %1331 = vmatpush.msrb.mxu0 %v1868_v15  ;;  %1402 = vmatpush.msra.mxu3 %v1869_v14  ;;  %v1900_v14 = vld [vmem:[%s2701_s3 + $0x218] ss:$0 sm:$0xff] }
 0xdaf   : > { %v1877_v19 = vpop.permute.xlu1 %1876 }
 0xdb0   : > { %1871 = vrot.lane.b32.xlu0 %v1870_v41, %s2050_s27  ;;  %v1878_v26 = vunpack.i.l.bf16 %v1877_v19  ;;  %v1879_v28 = vunpack.i.h.bf16 %v1877_v19  ;;  %s1998_s27 = scalar_lea.hbm %s1997_s7, 8 }
 0xdb1   : > { %p1999_p11 = scmp.ne.s32.totalorder %s1997_s7, %s1998_s27  ;;  %p2004_p1 = scmp.lt.s32.totalorder %s2002_s9, %s1998_s27 }
 0xdb3   : > { %p2000_p12 = pnand %p1999_p11, %p2115_p5  ;;  %p2005_p2 = por %p2004_p1, %p2003_p0 }
 0xdb5   : > { %p2001_p13 = pneg %p2000_p12 }
 0xdb7   : > { %p2006_p3 = pnand %p2005_p2, %p2001_p13 }
 0xe0f   : > { %v1441_v16 = vpop.xlane.xlu0 %1440 }
 0xe10   : > { %1976 = vrcp.f32 %v1441_v16 }
 0xe16   : > { %v1977_v33 = vpop.eup %1976 }
 0xe17   : > { %v1443_v30 = vmul.f32 %v1977_v33, %v1971_v4  ;;  %v1579_v4 = vld [vmem:[%s2701_s3 + $0x230] sm:$0xff] }
 0xe18   : > { %1603 = vmatpush.msra.mxu1 %v1579_v4 }
 0xe1a   : > { %1604 = vmatpush.msra.mxu1 %v1578_v12 }
 0xe1c   : > { %1605 = vmatpush.msra.mxu1 %v1577_v13 }
 0xe22   : > { %v1872_v20 = vpop.permute.xlu0 %1871 }
 0xe23   : > { %v1874_v21 = vunpack.i.h.bf16 %v1872_v20  ;;  %v1873_v22 = vunpack.i.l.bf16 %v1872_v20 }
 0xe25   : > { %1332 = vmatpush.msrb.mxu0 %v1873_v22  ;;  %1403 = vmatpush.msra.mxu3 %v1874_v21 }
 0xe26   : > { %1766 = vmatmul.msk.f32.vlgmr.msrb.gmra.mxu0 %vm499_vm2, %v1229_v59  ;;  %1770 = vmatmul.msk.f32.vlgmr.msra.gmra.mxu3 %vm499_vm2, %v1371_v25  ;;  %v1901_v25 = vld [vmem:[%s2701_s3 + $0x260] ss:$0 sm:$0xff] }
 0xe27   : > { %1474 = vmatpush.msra.mxu0 %v1878_v26  ;;  %1560 = vmatpush.msrb.mxu3 %v1542_v53 }
 0xe29   : > { %1475 = vmatpush.msra.mxu0 %v1879_v28 }
 0xe2e   : > { %1774 = vmatmul.msk.f32.vlgmr.msra.gmra.mxu0 %vm499_vm2, %v1443_v30 }
 0xea3   : > { %v1334_v32 = vpop.f32.mrf.mxu0 }
 0xea4   : > { %v1335_v39 = vadd.f32 %v1334_v32, %v1303_v60 }
 0xea9   : > { %v1405_v34 = vpop.f32.mrf.mxu3 }
 0xeaa   : > { %v1408_v27 = vadd.f32 %v1405_v34, %v1335_v39 }
 0xeab   : > { %v1477_v36 = vpop.f32.mrf.mxu0 }
 0xeac   : > { %v1480_v37 = vadd.f32 %v1477_v36, %v1408_v27 }
 0xeae   : > { %1775 = vmatmul.msk.f32.vlgmr.msrb.gmra.mxu2 %vm355_vm3, %v1480_v37 }
 0xf31   : > { %v1507_v40 = vpop.f32.mrf.mxu2 }
 0xf32   : > { %v1508_v41 = vadd.f32 %v1897_v38, %v1507_v40 }
 0xf34   : > { %v2606_v43 = vadd.f32 %v2443_v51, %v1508_v41  ;;  %v1541_v51 = vld [vmem:[%s2701_s3 + $0x208] sm:$0xff] }
 0xf35   : > { %1561 = vmatpush.msrb.mxu3 %v1541_v51 }
 0xf36   : > { %v1511_v44 = vsel %vm355_vm3, %v2606_v43, 0.0 }
 0xf37   : > { %1512 = vadd.xlane.f32.xlu2 %v1511_v44  ;;  %1562 = vmatpush.msrb.mxu3 %v1540_v54 }
 0xf39   : > { %1563 = vmatpush.msrb.mxu3 %v1539_v55 }
 0xfaa   : > { %v1513_v45 = vpop.xlane.xlu2 %1512 }
 0xfab   : > { %v1514_v47 = vmul.f32 %v1513_v45, %v2160_v42 }
 0xfad   : > { %v1515_v48 = vsub.f32 %v2606_v43, %v1514_v47 }
 0xfaf   : > { %v1516_v49 = vmul.f32 %v1515_v48, %v1515_v48 }
 0xfb1   : > { %v1517_v52 = vsel %vm355_vm3, %v1516_v49, 0.0 }
 0xfb2   : > { %1518 = vadd.xlane.f32.xlu1 %v1517_v52 }
0x1025   : > { %v1519_v56 = vpop.xlane.xlu1 %1518 }
0x1026   : > { %v1520_v58 = vmul.f32 %v1519_v56, %v2160_v42  ;;  %v1899_v42 = vld [vmem:[%s2701_s3 + $0x1f0] ss:$0 sm:$0xff] }
0x1028   : > { %v1521_v57 = vadd.f32 1e-05, %v1520_v58 }
0x102a   : > { %1978 = vrsqrt.f32 %v1521_v57  ;;  %vm1528_vm9 = vweird.f32 %v1521_v57 }
0x1030   : > { %v1979_v31 = vpop.eup %1978 }
0x1031   : > { %v1523_v60 = vmul.f32 %v1979_v31, %v1521_v57  ;;  %vm1529_vm2 = vweird.f32 %v1979_v31 }
0x1032   : > { %vm1530_vm10 = vmor %vm1528_vm9, %vm1529_vm2 }
0x1033   : > { %v1524_v62 = vmul.f32 %v1979_v31, %v1523_v60 }
0x1035   : > { %v1525_v63 = vmul.f32 0.5, %v1524_v62 }
0x1037   : > { %v1526_v0 = vsub.f32 1.5, %v1525_v63 }
0x1039   : > { %v1527_v23 = vmul.f32 %v1979_v31, %v1526_v0 }
0x103b   : > { %v1531_v2 = vsel %vm1530_vm10, %v1979_v31, %v1527_v23 }
0x103c   : > { %v1532_v24 = vmul.f32 %v1531_v2, %v1515_v48 }
0x103e   : > { %v1535_v5 = vmul.f32 %v1898_v1, %v1532_v24 }
0x1040   : > { %v1538_v50 = vadd.f32 %v1899_v42, %v1535_v5 }
0x1042   : > { %1776 = vmatmul.msk.f32.vlgmr.msrb.gmra.mxu3 %vm355_vm3, %v1538_v50 }
0x10c5   : > { %v1565_v15 = vpop.f32.mrf.mxu3 }
0x10c6   : > { %v1566_v8 = vadd.f32 %v1900_v14, %v1565_v15 }
0x10c8   : > { %v1568_v46 = vmul.f32 %v1566_v8, %v1566_v8 }
0x10ca   : > { %v1569_v16 = vmul.f32 %v1568_v46, %v1566_v8 }
0x10cc   : > { %v1570_v17 = vmul.f32 0.044715, %v1569_v16 }
0x10ce   : > { %v1571_v18 = vadd.f32 %v1570_v17, %v1566_v8 }
0x10d0   : > { %v1572_v19 = vmul.f32 0.7978846, %v1571_v18 }
0x10d2   : > { %1980 = vtanh.f32 %v1572_v19 }
0x10d8   : > { %v1981_v20 = vpop.eup %1980 }
0x10d9   : > { %v1574_v21 = vadd.f32 1.0, %v1981_v20 }
0x10db   : > { %v1575_v22 = vmul.f32 0.5, %v1574_v21 }
0x10dd   : > { %v1576_v59 = vmul.f32 %v1575_v22, %v1566_v8 }
0x10df   : > { %1777 = vmatmul.msk.f32.vlgmr.msra.gmra.mxu1 %vm1009_vm13, %v1576_v59 }
0x115c   : > { %v1607_v26 = vpop.f32.mrf.mxu1 }
0x115d   : > { %v1608_v28 = vadd.f32 %v1901_v25, %v1607_v26 }
0x115f   : > { %v1610_v33 = vadd.f32 %v1608_v28, %v2606_v43 }
0x1161   : > { %1611 = vst.msk [vmem:[%s214_s30] sm:$0xff] %vm355_vm3, %v1610_v33 }
0x1162   : > { %2009 = shalt.err (!%p2006_p3)
}
0x1163   : > { %1784 = dma.vmem_to_hbm [thread:$0]  (%p2115_p5), %s1626_s5, 128, %s1628_s6, %s1613_s19  }
0x1164 PF: > { %p1790_p4 = scmp.ge.s32.totalorder %s2044_s18, 2  ;;  %s1639_s12 = sand.u32 1, %s2032_s15  }
0x1165   : > { %s1640_s14 = scalar_lea.sflag [#allocation3], %s1639_s12 }
0x1166   : > { %p1787_p7 = pnand %p1790_p4, %p2119_p6 }
0x1168   : > { %p1788_p8 = pneg %p1787_p7 }
0x116a   : > { %2027 = dma.done.wait (%p1788_p8), %s1640_s14, 128  }
0x116b   : > { %2029 = vsyncadd (%p1788_p8), %s1640_s14, 4294967168  ;;  %p14_p9 = scmp.ge.s32.totalorder %s2102_s21, 4   ;;  %s2705_s15 = smov %s2036_s16 }
0x116c   : > { %s2706_s16 = smov %s2040_s17  ;;  %s2707_s17 = smov %s2113_s24 }
0x116d   : > { %s2708_s18 = smov %s2102_s21  ;;  %16 = sbr.rel (!%p14_p9) target bundleno = 3 (0x3), region = 77 }
0x1172   :  { %1646 = vsyncpa [#allocation3], 1 }
0x1173   :  { %1648 = vsyncpa [#allocation3 + $0x1], 1 }

</bundles_post_ra>
